<compile_context>
chip_gen: v5e
topology: v5e:2x2
jax: 0.10.0
libtpu: 0.0.40
codegen_flags: <defaults>
</compile_context>

<pallas_src>
import math

import jax
import jax.numpy as jnp
from jax.experimental import pallas as pl
from jax.experimental.pallas import tpu as pltpu  # noqa: F401  (TPU backend)

EPS = 1e-5        # torch.nn.LayerNorm default
ROW_TILE = 8      # f32 sublane tile
SPLIT = 128       # lane tile: 2nd block of fused weights starts here


def _rup(n, m):
    return ((n + m - 1) // m) * m


def _ln(x, g, b):
    mu = jnp.mean(x, axis=-1, keepdims=True)
    var = jnp.mean(jnp.square(x - mu), axis=-1, keepdims=True)
    return (x - mu) * jax.lax.rsqrt(var + EPS) * g + b


def _gelu(x):
    # exact erf GELU (torch.nn.GELU default)
    return 0.5 * x * (1.0 + jax.lax.erf(x * (1.0 / math.sqrt(2.0))))


# ----------------------------------------------------------------------------
# the single fused kernel (built by a factory that closes over the static
# packing layout and the model dimensions)
# ----------------------------------------------------------------------------
def make_kernel(layout, *, B, Lk, Lq, D, H, R):
    BLq = B * Lq
    scale = 1.0 / math.sqrt(D)
    f32 = jnp.float32

    # static row indices inside the packed "rowD" bias/scale block
    R_GQ, R_BQ, R_GKV, R_BKV, R_GFF, R_BFF, R_B2, R_GN, R_BN, R_BMLP = range(10)
    SELF_BASE = 10            # then 5 rows per repeat: g1, b1, g2, b2, b2f

    def kernel(x_ref, *refs):
        out_ref = refs[-1]
        slabs = refs[:-1]

        def take(name, r0=0, nrows=None):
            si, off, n = layout[name]
            if nrows is None:
                nrows = n
            return slabs[si][off + r0: off + r0 + nrows, :]

        def dr(i):            # (1, D) row from the packed D-wide bias slab
            return take("rowD", i, 1)

        def hr(i):            # (1, H) row from the packed H-wide bias slab
            return take("rowH", i, 1)

        # ---- embedding: x @ Wx^T + (pos_enc @ Wp^T + b_emb) ----
        x_emb = jnp.dot(x_ref[...], take("wxT"),
                        preferred_element_type=f32) + take("pe")

        # ---- CrossTransformer (single head, no biases) ----
        lat = take("lat")                                     # (B*Lq, D)
        q = _ln(lat, dr(R_GQ), dr(R_BQ))
        kv = _ln(x_emb, dr(R_GKV), dr(R_BKV))

        Q = jnp.dot(q, take("wqT"), preferred_element_type=f32)    # (B*Lq, D)
        KV = jnp.dot(kv, take("wkvT"), preferred_element_type=f32)  # (B*Lk, 128+D)
        K = KV[:, :D]                                               # lane-aligned
        V = KV[:, SPLIT:SPLIT + D]                                  # starts @128

        # per-batch attention on row blocks (no cross-batch masked waste)
        attn_parts = []
        for b in range(B):
            Qb = Q[b * Lq:(b + 1) * Lq, :]
            Kb = K[b * Lk:(b + 1) * Lk, :]
            Vb = V[b * Lk:(b + 1) * Lk, :]
            s = jax.lax.dot_general(Qb, Kb, (((1,), (1,)), ((), ())),
                                    preferred_element_type=f32) * scale
            s = s - jnp.max(s, axis=-1, keepdims=True)
            p = jnp.exp(s)
            p = p * pl.reciprocal(jnp.sum(p, axis=-1, keepdims=True), approx=False)
            attn_parts.append(jnp.dot(p, Vb, preferred_element_type=f32))
        attn = jnp.concatenate(attn_parts, axis=0)             # (B*Lq, D)
        attn = jnp.dot(attn, take("woT"), preferred_element_type=f32)

        q_mid = attn + lat                                     # residual
        y = _ln(q_mid, dr(R_GFF), dr(R_BFF))
        h = _gelu(jnp.dot(y, take("w1T"), preferred_element_type=f32) + hr(0))
        ff = jnp.dot(h, take("w2T"), preferred_element_type=f32) + dr(R_B2)
        bott = ff + q_mid                                      # (B*Lq, D)

        # ---- repeat x SelfFourier: Re[FFT2(LN(x))] + x, then PreNorm FF ----
        # Re[FFT2(y)] == cosL @ y @ cosD - sinL @ y @ sinD (exact, real input),
        # evaluated with 2 matmuls per repeat:
        #   Z = y @ [cosD | -sinD] ;  fnet = [blk(cosL)|blk(sinL)] @ [Zc ; Zs]
        clsl = take("clsl")          # (B*Lq, 2*B*Lq)
        cdnsd = take("cdnsd")        # (D, 128+D)
        for r in range(R):
            base = SELF_BASE + 5 * r
            y = _ln(bott, dr(base + 0), dr(base + 1))
            Z = jnp.dot(y, cdnsd, preferred_element_type=f32)   # (B*Lq, 128+D)
            zstack = jnp.concatenate([Z[:, :D], Z[:, SPLIT:SPLIT + D]], axis=0)
            fnet = jnp.dot(clsl, zstack, preferred_element_type=f32)
            x1 = fnet + bott
            y2 = _ln(x1, dr(base + 2), dr(base + 3))
            h = _gelu(jnp.dot(y2, take("sw1T", r * D, D),
                              preferred_element_type=f32) + hr(1 + r))
            ffr = jnp.dot(h, take("sw2T", r * H, H),
                          preferred_element_type=f32) + dr(base + 4)
            bott = ffr + x1

        # ---- head: mean over latent tokens -> LayerNorm -> GELU -> Linear ----
        pooled = jnp.concatenate(
            [jnp.mean(bott[b * Lq:(b + 1) * Lq, :], axis=0, keepdims=True)
             for b in range(B)], axis=0)                        # (B, D)
        pooled = _gelu(_ln(pooled, dr(R_GN), dr(R_BN)))
        head = jnp.dot(pooled, take("wmlpT"),
                       preferred_element_type=f32) + dr(R_BMLP)  # (B, D) padded

        # one combined output slab: rows [0, B*Lq) = bottleneck, next B = head
        out_ref[:BLq, :] = bott
        out_ref[BLq:BLq + B, :] = head

    return kernel


# ----------------------------------------------------------------------------
# parameter construction / packing (setup-time, tiny)
# ----------------------------------------------------------------------------
def fourier_encoding(shape, bands):
    """JAX port of the torch `fourier_encoding` helper."""
    dims = len(shape)
    axes = [jnp.linspace(-1.0, 1.0, n) for n in shape]
    pos = jnp.stack(jnp.meshgrid(*axes, indexing="ij"))          # (dims, *shape)
    org_pos = pos
    pos_b = jnp.broadcast_to(pos[None], (bands,) + pos.shape)
    freqs = jnp.logspace(math.log(1.0), math.log(shape[0] / 2), num=bands, base=math.e)
    freqs = freqs.reshape((bands,) + (1,) * pos.ndim)
    result = (freqs * math.pi * pos_b).reshape((dims * bands,) + tuple(shape))
    return jnp.concatenate([jnp.sin(result), jnp.cos(result), org_pos], axis=0)


def init_raw_params(key, *, C, D, H, Lq, R, O, bands):
    pec = 2 * bands + 1  # sin + cos per band + raw 1-D position

    def nrm(k, shape, s):
        return (s * jax.random.normal(k, shape)).astype(jnp.float32)

    ks = iter(jax.random.split(key, 11 + 4 * R))
    ones = lambda n: jnp.ones((n,), jnp.float32)
    zeros = lambda n: jnp.zeros((n,), jnp.float32)

    raw = dict(
        latent1=nrm(next(ks), (Lq, D), 1.0),
        emb_w=nrm(next(ks), (D, C + pec), 0.1),
        emb_b=nrm(next(ks), (D,), 0.02),
        ln_q_g=ones(D), ln_q_b=zeros(D),
        ln_kv_g=ones(D), ln_kv_b=zeros(D),
        in_proj_w=nrm(next(ks), (3 * D, D), 0.1),
        out_proj_w=nrm(next(ks), (D, D), 0.1),
        ff_ln_g=ones(D), ff_ln_b=zeros(D),
        ff_w1=nrm(next(ks), (H, D), 0.1), ff_b1=nrm(next(ks), (H,), 0.02),
        ff_w2=nrm(next(ks), (D, H), 0.1), ff_b2=nrm(next(ks), (D,), 0.02),
        norm_g=ones(D), norm_b=zeros(D),
        mlp_w=nrm(next(ks), (O, D), 0.1), mlp_b=nrm(next(ks), (O,), 0.02),
        selfs=[],
    )
    for _ in range(R):
        raw["selfs"].append(dict(
            ln1_g=ones(D), ln1_b=zeros(D),
            ln2_g=ones(D), ln2_b=zeros(D),
            w1=nrm(next(ks), (H, D), 0.1), b1=nrm(next(ks), (H,), 0.02),
            w2=nrm(next(ks), (D, H), 0.1), b2=nrm(next(ks), (D,), 0.02),
        ))
    return raw


def pack_constants(named):
    """Group 2-D f32 constants by column width; concat along rows with each
    piece padded to a multiple of 8 rows (sublane tile).  Returns the slab
    list and a layout dict  name -> (slab_index, row_offset, num_rows)."""
    groups, widths = {}, []
    for name, arr in named:
        w = int(arr.shape[1])
        if w not in groups:
            groups[w] = []
            widths.append(w)
        groups[w].append((name, jnp.asarray(arr, jnp.float32)))
    slabs, layout = [], {}
    for si, w in enumerate(widths):
        pieces, off = [], 0
        for name, arr in groups[w]:
            r = int(arr.shape[0])
            rp = _rup(r, ROW_TILE)
            if rp != r:
                arr = jnp.concatenate([arr, jnp.zeros((rp - r, w), jnp.float32)], 0)
            pieces.append(arr)
            layout[name] = (si, off, r)
            off += rp
        slabs.append(jnp.concatenate(pieces, axis=0))
    return slabs, layout


def prepare_kernel_params(raw, *, B, Lk, C, bands):
    """Fold parameter-only work (transposes, pos-encoding embed, DFT factors,
    K/V + DFT fusions, batch tiling) into a few packed VMEM slabs.  Runs once."""
    f32 = jnp.float32
    Lq, D = raw["latent1"].shape
    H = raw["ff_w1"].shape[0]
    O = raw["mlp_w"].shape[0]
    R = len(raw["selfs"])
    Cp = _rup(C, ROW_TILE)

    enc = fourier_encoding((Lk,), bands)                       # (pec, Lk)
    emb_w, emb_b = raw["emb_w"], raw["emb_b"]
    wx, wp = emb_w[:, :C], emb_w[:, C:]
    wxT = jnp.zeros((Cp, D), f32).at[:C].set(wx.T)
    pe = enc.T @ wp.T + emb_b                                  # (Lk, D)

    wq, wk, wv = jnp.split(raw["in_proj_w"], 3, axis=0)
    wkvT = (jnp.zeros((D, SPLIT + D), f32)
            .at[:, :D].set(wk.T).at[:, SPLIT:].set(wv.T))      # fused K|V proj

    def cos_sin(n):
        idx = jnp.arange(n, dtype=f32)
        ang = (2.0 * math.pi / n) * jnp.outer(idx, idx)
        return jnp.cos(ang), jnp.sin(ang)

    cl, sl = cos_sin(Lq)
    cd, sd = cos_sin(D)
    eye_b = jnp.eye(B, dtype=f32)
    clsl = jnp.concatenate([jnp.kron(eye_b, cl), jnp.kron(eye_b, sl)], axis=1)
    cdnsd = (jnp.zeros((D, SPLIT + D), f32)
             .at[:, :D].set(cd).at[:, SPLIT:].set(-sd))        # fused [cosD|-sinD]

    row = lambda v: jnp.asarray(v, f32).reshape(1, -1)
    rowD = [row(raw["ln_q_g"]), row(raw["ln_q_b"]),
            row(raw["ln_kv_g"]), row(raw["ln_kv_b"]),
            row(raw["ff_ln_g"]), row(raw["ff_ln_b"]),
            row(raw["ff_b2"]),
            row(raw["norm_g"]), row(raw["norm_b"]),
            jnp.zeros((1, D), f32).at[:, :O].set(row(raw["mlp_b"]))]
    rowH = [row(raw["ff_b1"])]
    for sp in raw["selfs"]:
        rowD += [row(sp["ln1_g"]), row(sp["ln1_b"]),
                 row(sp["ln2_g"]), row(sp["ln2_b"]), row(sp["b2"])]
        rowH += [row(sp["b1"])]
    rowD = jnp.concatenate(rowD, axis=0)                       # (10 + 5R, D)
    rowH = jnp.concatenate(rowH, axis=0)                       # (1 + R, H)

    named = [
        ("wxT", wxT),
        ("pe", jnp.tile(pe, (B, 1))),                          # (B*Lk, D)
        ("lat", jnp.tile(raw["latent1"], (B, 1))),             # (B*Lq, D)
        ("wqT", wq.T),
        ("woT", raw["out_proj_w"].T),
        ("w1T", raw["ff_w1"].T),
        ("w2T", raw["ff_w2"].T),
        ("clsl", clsl),
        ("cdnsd", cdnsd),
        ("wkvT", wkvT),
        ("sw1T", jnp.concatenate([sp["w1"].T for sp in raw["selfs"]], axis=0)),
        ("sw2T", jnp.concatenate([sp["w2"].T for sp in raw["selfs"]], axis=0)),
        ("wmlpT", jnp.zeros((D, D), f32).at[:, :O].set(raw["mlp_w"].T)),
        ("rowD", rowD),
        ("rowH", rowH),
    ]
    slabs, layout = pack_constants(named)
    dims = dict(B=B, Lk=Lk, Lq=Lq, D=D, H=H, R=R, O=O, Cp=Cp)
    return slabs, layout, dims


# ----------------------------------------------------------------------------
# wrapper: single fused pallas_call (share=1, the module default)
# ----------------------------------------------------------------------------
def build_forward(layout, dims):
    B, Lk, Lq, D = dims["B"], dims["Lk"], dims["Lq"], dims["D"]
    H, R, O, Cp = dims["H"], dims["R"], dims["O"], dims["Cp"]
    BLq = B * Lq
    out_rows = BLq + _rup(B, ROW_TILE)
    kernel = make_kernel(layout, B=B, Lk=Lk, Lq=Lq, D=D, H=H, R=R)

    @jax.jit
    def forward(x, slabs):
        xb, xl, xc = x.shape
        x2 = jnp.pad(x.reshape(xb * xl, xc).astype(jnp.float32),
                     ((0, 0), (0, Cp - xc)))
        out = pl.pallas_call(
            kernel,
            out_shape=jax.ShapeDtypeStruct((out_rows, D), jnp.float32),
        )(x2, *slabs)
        head = out[BLq:BLq + B, :O]
        bott = out[:BLq, :].reshape(B, Lq, D)
        return head, bott

    return forward


# ----------------------------------------------------------------------------
# pure-JAX reference (mirrors the torch module, eval mode / share=1)
# ----------------------------------------------------------------------------
def reference_forward(x, raw, bands):
    B, Lk, C = x.shape
    Lq, D = raw["latent1"].shape
    enc = fourier_encoding((Lk,), bands)                       # (pec, Lk)

    def ln(v, g, b):
        mu = v.mean(-1, keepdims=True)
        var = jnp.square(v - mu).mean(-1, keepdims=True)
        return (v - mu) / jnp.sqrt(var + EPS) * g + b

    gelu = lambda v: jax.nn.gelu(v, approximate=False)

    xs = jnp.transpose(x, (1, 0, 2))                           # (Lk, B, C)
    pos = jnp.broadcast_to(enc[None], (B,) + enc.shape)
    pos = jnp.transpose(pos, (2, 0, 1))                        # (Lk, B, pec)
    xe = jnp.concatenate([xs, pos], axis=-1) @ raw["emb_w"].T + raw["emb_b"]

    latent = jnp.broadcast_to(raw["latent1"][:, None, :], (Lq, B, D))

    q = ln(latent, raw["ln_q_g"], raw["ln_q_b"])
    kv = ln(xe, raw["ln_kv_g"], raw["ln_kv_b"])
    wq, wk, wv = jnp.split(raw["in_proj_w"], 3, axis=0)
    Q, K, V = q @ wq.T, kv @ wk.T, kv @ wv.T
    s = jnp.einsum("qbd,kbd->bqk", Q, K) / math.sqrt(D)
    p = jax.nn.softmax(s, axis=-1)
    attn = jnp.einsum("bqk,kbd->qbd", p, V) @ raw["out_proj_w"].T
    q_mid = attn + latent
    y = ln(q_mid, raw["ff_ln_g"], raw["ff_ln_b"])
    ff = gelu(y @ raw["ff_w1"].T + raw["ff_b1"]) @ raw["ff_w2"].T + raw["ff_b2"]
    bott = jnp.transpose(ff + q_mid, (1, 0, 2))                # (B, Lq, D)

    for sp in raw["selfs"]:
        y = ln(bott, sp["ln1_g"], sp["ln1_b"])
        fnet = jnp.real(jnp.fft.fftn(y, axes=(-2, -1))).astype(jnp.float32)
        x1 = fnet + bott
        y2 = ln(x1, sp["ln2_g"], sp["ln2_b"])
        ffo = gelu(y2 @ sp["w1"].T + sp["b1"]) @ sp["w2"].T + sp["b2"]
        bott = ffo + x1

    out = jnp.transpose(bott, (1, 0, 2)).mean(axis=0)          # (B, D)
    out = gelu(ln(out, raw["norm_g"], raw["norm_b"]))
    out = out @ raw["mlp_w"].T + raw["mlp_b"]                  # (B, O)
    return out, bott


if __name__ == "__main__":
    # Shapes implied by HB_transformer: shape=(channel, input_len)=(4, 16),
    # batch=2, d_models=32, mlp_dim=64, latent1_len=8, fourier_band=4,
    # repeat=2, output=1, share=1 (dropout inactive at inference).
    B, C, Lk = 2, 4, 16
    D, H, Lq, R, O, bands = 32, 64, 8, 2, 1, 4

    key = jax.random.PRNGKey(0)
    kx, kpar = jax.random.split(key)
    x = jax.random.normal(kx, (B, Lk, C), dtype=jnp.float32)

    raw = init_raw_params(kpar, C=C, D=D, H=H, Lq=Lq, R=R, O=O, bands=bands)
    slabs, layout, dims = prepare_kernel_params(raw, B=B, Lk=Lk, C=C, bands=bands)
    forward = build_forward(layout, dims)

    head, bott = forward(x, slabs)
    head, bott = jax.block_until_ready((head, bott))
    assert head.shape == (B, O), head.shape

    ref_head, ref_bott = reference_forward(x, raw, bands)
    bott_err = float(jnp.max(jnp.abs(bott - ref_bott)))
    head_err = float(jnp.max(jnp.abs(head - ref_head)))
    assert jnp.allclose(bott, ref_bott, atol=5e-3, rtol=5e-3), f"bottleneck err {bott_err}"
    assert jnp.allclose(head, ref_head, atol=2e-3, rtol=2e-3), f"head err {head_err}"
    print("KERNEL_OK")
</pallas_src>

<mosaic_0001>
module attributes {stable_mosaic.version = 11 : i64} {
  func.func @kernel(%arg0: memref<32x8xf32, #tpu.memory_space<vmem>>, %arg1: memref<384x32xf32, #tpu.memory_space<vmem>>, %arg2: memref<104x64xf32, #tpu.memory_space<vmem>>, %arg3: memref<64x160xf32, #tpu.memory_space<vmem>>, %arg4: memref<24x32xf32, #tpu.memory_space<vmem>>) attributes {dimension_semantics = [], scalar_prefetch = 0 : i64, scratch_operands = 0 : i64, tpu.core_type = #tpu.core_type<tc>} {
    %c0 = arith.constant 0 : index
    %c0_0 = arith.constant 0 : index
    %0 = vector.load %arg0[%c0, %c0_0] : memref<32x8xf32, #tpu.memory_space<vmem>>, vector<32x8xf32>
    %c0_1 = arith.constant 0 : index
    %c0_2 = arith.constant 0 : index
    %1 = vector.load %arg1[%c0_1, %c0_2] : memref<384x32xf32, #tpu.memory_space<vmem>>, vector<8x32xf32>
    %cst = arith.constant dense<0.000000e+00> : vector<32x32xf32>
    %2 = tpu.matmul %0, %1, %cst {dimension_numbers = #tpu.dot_dimension_numbers<[1], [0], [0], [1], [0, 0, 1, 1], [], []>} : vector<32x8xf32>, vector<8x32xf32>, vector<32x32xf32> -> vector<32x32xf32>
    %c8 = arith.constant 8 : index
    %c0_3 = arith.constant 0 : index
    %3 = vector.load %arg1[%c8, %c0_3] : memref<384x32xf32, #tpu.memory_space<vmem>>, vector<32x32xf32>
    %4 = arith.addf %2, %3 : vector<32x32xf32>
    %c40 = arith.constant 40 : index
    %c0_4 = arith.constant 0 : index
    %5 = vector.load %arg1[%c40, %c0_4] : memref<384x32xf32, #tpu.memory_space<vmem>>, vector<16x32xf32>
    %c360 = arith.constant 360 : index
    %c0_5 = arith.constant 0 : index
    %6 = vector.load %arg1[%c360, %c0_5] : memref<384x32xf32, #tpu.memory_space<vmem>>, vector<1x32xf32>
    %c361 = arith.constant 361 : index
    %c0_6 = arith.constant 0 : index
    %7 = vector.load %arg1[%c361, %c0_6] : memref<384x32xf32, #tpu.memory_space<vmem>>, vector<1x32xf32>
    %cst_7 = arith.constant dense<0.000000e+00> : vector<16xf32>
    %8 = vector.multi_reduction <add>, %5, %cst_7 [1] : vector<16x32xf32> to vector<16xf32>
    %9 = vector.shape_cast %8 : vector<16xf32> to vector<16x1xf32>
    %cst_8 = arith.constant 3.200000e+01 : f32
    %10 = vector.broadcast %cst_8 : f32 to vector<16x1xf32>
    %11 = arith.divf %9, %10 : vector<16x1xf32>
    %12 = vector.broadcast %11 : vector<16x1xf32> to vector<16x32xf32>
    %13 = arith.subf %5, %12 : vector<16x32xf32>
    %14 = arith.mulf %13, %13 : vector<16x32xf32>
    %cst_9 = arith.constant dense<0.000000e+00> : vector<16xf32>
    %15 = vector.multi_reduction <add>, %14, %cst_9 [1] : vector<16x32xf32> to vector<16xf32>
    %16 = vector.shape_cast %15 : vector<16xf32> to vector<16x1xf32>
    %cst_10 = arith.constant 3.200000e+01 : f32
    %17 = vector.broadcast %cst_10 : f32 to vector<16x1xf32>
    %18 = arith.divf %16, %17 : vector<16x1xf32>
    %19 = vector.broadcast %11 : vector<16x1xf32> to vector<16x32xf32>
    %20 = arith.subf %5, %19 : vector<16x32xf32>
    %cst_11 = arith.constant 9.99999974E-6 : f32
    %21 = vector.broadcast %cst_11 : f32 to vector<16x1xf32>
    %22 = arith.addf %18, %21 : vector<16x1xf32>
    %23 = math.rsqrt %22 : vector<16x1xf32>
    %24 = vector.broadcast %23 : vector<16x1xf32> to vector<16x32xf32>
    %25 = arith.mulf %20, %24 : vector<16x32xf32>
    %26 = vector.broadcast %6 : vector<1x32xf32> to vector<16x32xf32>
    %27 = arith.mulf %25, %26 : vector<16x32xf32>
    %28 = vector.broadcast %7 : vector<1x32xf32> to vector<16x32xf32>
    %29 = arith.addf %27, %28 : vector<16x32xf32>
    %c362 = arith.constant 362 : index
    %c0_12 = arith.constant 0 : index
    %30 = vector.load %arg1[%c362, %c0_12] : memref<384x32xf32, #tpu.memory_space<vmem>>, vector<1x32xf32>
    %c363 = arith.constant 363 : index
    %c0_13 = arith.constant 0 : index
    %31 = vector.load %arg1[%c363, %c0_13] : memref<384x32xf32, #tpu.memory_space<vmem>>, vector<1x32xf32>
    %cst_14 = arith.constant dense<0.000000e+00> : vector<32xf32>
    %32 = vector.multi_reduction <add>, %4, %cst_14 [1] : vector<32x32xf32> to vector<32xf32>
    %33 = vector.shape_cast %32 : vector<32xf32> to vector<32x1xf32>
    %cst_15 = arith.constant 3.200000e+01 : f32
    %34 = vector.broadcast %cst_15 : f32 to vector<32x1xf32>
    %35 = arith.divf %33, %34 : vector<32x1xf32>
    %36 = vector.broadcast %35 : vector<32x1xf32> to vector<32x32xf32>
    %37 = arith.subf %4, %36 : vector<32x32xf32>
    %38 = arith.mulf %37, %37 : vector<32x32xf32>
    %cst_16 = arith.constant dense<0.000000e+00> : vector<32xf32>
    %39 = vector.multi_reduction <add>, %38, %cst_16 [1] : vector<32x32xf32> to vector<32xf32>
    %40 = vector.shape_cast %39 : vector<32xf32> to vector<32x1xf32>
    %cst_17 = arith.constant 3.200000e+01 : f32
    %41 = vector.broadcast %cst_17 : f32 to vector<32x1xf32>
    %42 = arith.divf %40, %41 : vector<32x1xf32>
    %43 = vector.broadcast %35 : vector<32x1xf32> to vector<32x32xf32>
    %44 = arith.subf %4, %43 : vector<32x32xf32>
    %cst_18 = arith.constant 9.99999974E-6 : f32
    %45 = vector.broadcast %cst_18 : f32 to vector<32x1xf32>
    %46 = arith.addf %42, %45 : vector<32x1xf32>
    %47 = math.rsqrt %46 : vector<32x1xf32>
    %48 = vector.broadcast %47 : vector<32x1xf32> to vector<32x32xf32>
    %49 = arith.mulf %44, %48 : vector<32x32xf32>
    %50 = vector.broadcast %30 : vector<1x32xf32> to vector<32x32xf32>
    %51 = arith.mulf %49, %50 : vector<32x32xf32>
    %52 = vector.broadcast %31 : vector<1x32xf32> to vector<32x32xf32>
    %53 = arith.addf %51, %52 : vector<32x32xf32>
    %c56 = arith.constant 56 : index
    %c0_19 = arith.constant 0 : index
    %54 = vector.load %arg1[%c56, %c0_19] : memref<384x32xf32, #tpu.memory_space<vmem>>, vector<32x32xf32>
    %cst_20 = arith.constant dense<0.000000e+00> : vector<16x32xf32>
    %55 = tpu.matmul %29, %54, %cst_20 {dimension_numbers = #tpu.dot_dimension_numbers<[1], [0], [0], [1], [0, 0, 1, 1], [], []>} : vector<16x32xf32>, vector<32x32xf32>, vector<16x32xf32> -> vector<16x32xf32>
    %c32 = arith.constant 32 : index
    %c0_21 = arith.constant 0 : index
    %56 = vector.load %arg3[%c32, %c0_21] : memref<64x160xf32, #tpu.memory_space<vmem>>, vector<32x160xf32>
    %cst_22 = arith.constant dense<0.000000e+00> : vector<32x160xf32>
    %57 = tpu.matmul %53, %56, %cst_22 {dimension_numbers = #tpu.dot_dimension_numbers<[1], [0], [0], [1], [0, 0, 1, 1], [], []>} : vector<32x32xf32>, vector<32x160xf32>, vector<32x160xf32> -> vector<32x160xf32>
    %58 = vector.extract_strided_slice %57 {offsets = [0, 0], sizes = [32, 32], strides = [1, 1]} : vector<32x160xf32> to vector<32x32xf32>
    %59 = vector.extract_strided_slice %57 {offsets = [0, 128], sizes = [32, 32], strides = [1, 1]} : vector<32x160xf32> to vector<32x32xf32>
    %60 = vector.extract_strided_slice %55 {offsets = [0, 0], sizes = [8, 32], strides = [1, 1]} : vector<16x32xf32> to vector<8x32xf32>
    %61 = vector.extract_strided_slice %58 {offsets = [0, 0], sizes = [16, 32], strides = [1, 1]} : vector<32x32xf32> to vector<16x32xf32>
    %62 = vector.extract_strided_slice %59 {offsets = [0, 0], sizes = [16, 32], strides = [1, 1]} : vector<32x32xf32> to vector<16x32xf32>
    %cst_23 = arith.constant dense<0.000000e+00> : vector<8x16xf32>
    %63 = tpu.matmul %60, %61, %cst_23 {dimension_numbers = #tpu.dot_dimension_numbers<[1], [1], [0], [0], [0, 0, 1, 0], [], []>} : vector<8x32xf32>, vector<16x32xf32>, vector<8x16xf32> -> vector<8x16xf32>
    %cst_24 = arith.constant 0.176776692 : f32
    %64 = vector.broadcast %cst_24 : f32 to vector<8x16xf32>
    %65 = arith.mulf %63, %64 : vector<8x16xf32>
    %cst_25 = arith.constant dense<0xFF800000> : vector<8xf32>
    %66 = vector.multi_reduction <maximumf>, %65, %cst_25 [1] : vector<8x16xf32> to vector<8xf32>
    %67 = vector.shape_cast %66 : vector<8xf32> to vector<8x1xf32>
    %68 = vector.broadcast %67 : vector<8x1xf32> to vector<8x16xf32>
    %69 = arith.subf %65, %68 : vector<8x16xf32>
    %70 = math.exp %69 : vector<8x16xf32>
    %cst_26 = arith.constant dense<0.000000e+00> : vector<8xf32>
    %71 = vector.multi_reduction <add>, %70, %cst_26 [1] : vector<8x16xf32> to vector<8xf32>
    %72 = vector.shape_cast %71 : vector<8xf32> to vector<8x1xf32>
    %73 = tpu.reciprocal %72 : vector<8x1xf32> -> vector<8x1xf32>
    %74 = vector.broadcast %73 : vector<8x1xf32> to vector<8x16xf32>
    %75 = arith.mulf %70, %74 : vector<8x16xf32>
    %cst_27 = arith.constant dense<0.000000e+00> : vector<8x32xf32>
    %76 = tpu.matmul %75, %62, %cst_27 {dimension_numbers = #tpu.dot_dimension_numbers<[1], [0], [0], [1], [0, 0, 1, 1], [], []>} : vector<8x16xf32>, vector<16x32xf32>, vector<8x32xf32> -> vector<8x32xf32>
    %77 = vector.extract_strided_slice %55 {offsets = [8, 0], sizes = [8, 32], strides = [1, 1]} : vector<16x32xf32> to vector<8x32xf32>
    %78 = vector.extract_strided_slice %58 {offsets = [16, 0], sizes = [16, 32], strides = [1, 1]} : vector<32x32xf32> to vector<16x32xf32>
    %79 = vector.extract_strided_slice %59 {offsets = [16, 0], sizes = [16, 32], strides = [1, 1]} : vector<32x32xf32> to vector<16x32xf32>
    %cst_28 = arith.constant dense<0.000000e+00> : vector<8x16xf32>
    %80 = tpu.matmul %77, %78, %cst_28 {dimension_numbers = #tpu.dot_dimension_numbers<[1], [1], [0], [0], [0, 0, 1, 0], [], []>} : vector<8x32xf32>, vector<16x32xf32>, vector<8x16xf32> -> vector<8x16xf32>
    %cst_29 = arith.constant 0.176776692 : f32
    %81 = vector.broadcast %cst_29 : f32 to vector<8x16xf32>
    %82 = arith.mulf %80, %81 : vector<8x16xf32>
    %cst_30 = arith.constant dense<0xFF800000> : vector<8xf32>
    %83 = vector.multi_reduction <maximumf>, %82, %cst_30 [1] : vector<8x16xf32> to vector<8xf32>
    %84 = vector.shape_cast %83 : vector<8xf32> to vector<8x1xf32>
    %85 = vector.broadcast %84 : vector<8x1xf32> to vector<8x16xf32>
    %86 = arith.subf %82, %85 : vector<8x16xf32>
    %87 = math.exp %86 : vector<8x16xf32>
    %cst_31 = arith.constant dense<0.000000e+00> : vector<8xf32>
    %88 = vector.multi_reduction <add>, %87, %cst_31 [1] : vector<8x16xf32> to vector<8xf32>
    %89 = vector.shape_cast %88 : vector<8xf32> to vector<8x1xf32>
    %90 = tpu.reciprocal %89 : vector<8x1xf32> -> vector<8x1xf32>
    %91 = vector.broadcast %90 : vector<8x1xf32> to vector<8x16xf32>
    %92 = arith.mulf %87, %91 : vector<8x16xf32>
    %cst_32 = arith.constant dense<0.000000e+00> : vector<8x32xf32>
    %93 = tpu.matmul %92, %79, %cst_32 {dimension_numbers = #tpu.dot_dimension_numbers<[1], [0], [0], [1], [0, 0, 1, 1], [], []>} : vector<8x16xf32>, vector<16x32xf32>, vector<8x32xf32> -> vector<8x32xf32>
    %94 = tpu.concatenate %76, %93 in 0 : vector<8x32xf32>, vector<8x32xf32> -> vector<16x32xf32>
    %c88 = arith.constant 88 : index
    %c0_33 = arith.constant 0 : index
    %95 = vector.load %arg1[%c88, %c0_33] : memref<384x32xf32, #tpu.memory_space<vmem>>, vector<32x32xf32>
    %cst_34 = arith.constant dense<0.000000e+00> : vector<16x32xf32>
    %96 = tpu.matmul %94, %95, %cst_34 {dimension_numbers = #tpu.dot_dimension_numbers<[1], [0], [0], [1], [0, 0, 1, 1], [], []>} : vector<16x32xf32>, vector<32x32xf32>, vector<16x32xf32> -> vector<16x32xf32>
    %97 = arith.addf %96, %5 : vector<16x32xf32>
    %c364 = arith.constant 364 : index
    %c0_35 = arith.constant 0 : index
    %98 = vector.load %arg1[%c364, %c0_35] : memref<384x32xf32, #tpu.memory_space<vmem>>, vector<1x32xf32>
    %c365 = arith.constant 365 : index
    %c0_36 = arith.constant 0 : index
    %99 = vector.load %arg1[%c365, %c0_36] : memref<384x32xf32, #tpu.memory_space<vmem>>, vector<1x32xf32>
    %cst_37 = arith.constant dense<0.000000e+00> : vector<16xf32>
    %100 = vector.multi_reduction <add>, %97, %cst_37 [1] : vector<16x32xf32> to vector<16xf32>
    %101 = vector.shape_cast %100 : vector<16xf32> to vector<16x1xf32>
    %cst_38 = arith.constant 3.200000e+01 : f32
    %102 = vector.broadcast %cst_38 : f32 to vector<16x1xf32>
    %103 = arith.divf %101, %102 : vector<16x1xf32>
    %104 = vector.broadcast %103 : vector<16x1xf32> to vector<16x32xf32>
    %105 = arith.subf %97, %104 : vector<16x32xf32>
    %106 = arith.mulf %105, %105 : vector<16x32xf32>
    %cst_39 = arith.constant dense<0.000000e+00> : vector<16xf32>
    %107 = vector.multi_reduction <add>, %106, %cst_39 [1] : vector<16x32xf32> to vector<16xf32>
    %108 = vector.shape_cast %107 : vector<16xf32> to vector<16x1xf32>
    %cst_40 = arith.constant 3.200000e+01 : f32
    %109 = vector.broadcast %cst_40 : f32 to vector<16x1xf32>
    %110 = arith.divf %108, %109 : vector<16x1xf32>
    %111 = vector.broadcast %103 : vector<16x1xf32> to vector<16x32xf32>
    %112 = arith.subf %97, %111 : vector<16x32xf32>
    %cst_41 = arith.constant 9.99999974E-6 : f32
    %113 = vector.broadcast %cst_41 : f32 to vector<16x1xf32>
    %114 = arith.addf %110, %113 : vector<16x1xf32>
    %115 = math.rsqrt %114 : vector<16x1xf32>
    %116 = vector.broadcast %115 : vector<16x1xf32> to vector<16x32xf32>
    %117 = arith.mulf %112, %116 : vector<16x32xf32>
    %118 = vector.broadcast %98 : vector<1x32xf32> to vector<16x32xf32>
    %119 = arith.mulf %117, %118 : vector<16x32xf32>
    %120 = vector.broadcast %99 : vector<1x32xf32> to vector<16x32xf32>
    %121 = arith.addf %119, %120 : vector<16x32xf32>
    %c0_42 = arith.constant 0 : index
    %c0_43 = arith.constant 0 : index
    %122 = vector.load %arg2[%c0_42, %c0_43] : memref<104x64xf32, #tpu.memory_space<vmem>>, vector<32x64xf32>
    %cst_44 = arith.constant dense<0.000000e+00> : vector<16x64xf32>
    %123 = tpu.matmul %121, %122, %cst_44 {dimension_numbers = #tpu.dot_dimension_numbers<[1], [0], [0], [1], [0, 0, 1, 1], [], []>} : vector<16x32xf32>, vector<32x64xf32>, vector<16x64xf32> -> vector<16x64xf32>
    %c96 = arith.constant 96 : index
    %c0_45 = arith.constant 0 : index
    %124 = vector.load %arg2[%c96, %c0_45] : memref<104x64xf32, #tpu.memory_space<vmem>>, vector<1x64xf32>
    %125 = vector.broadcast %124 : vector<1x64xf32> to vector<16x64xf32>
    %126 = arith.addf %123, %125 : vector<16x64xf32>
    %cst_46 = arith.constant 5.000000e-01 : f32
    %127 = vector.broadcast %cst_46 : f32 to vector<16x64xf32>
    %128 = arith.mulf %127, %126 : vector<16x64xf32>
    %cst_47 = arith.constant 0.707106769 : f32
    %129 = vector.broadcast %cst_47 : f32 to vector<16x64xf32>
    %130 = arith.mulf %126, %129 : vector<16x64xf32>
    %131 = math.erf %130 : vector<16x64xf32>
    %cst_48 = arith.constant 1.000000e+00 : f32
    %132 = vector.broadcast %cst_48 : f32 to vector<16x64xf32>
    %133 = arith.addf %132, %131 : vector<16x64xf32>
    %134 = arith.mulf %128, %133 : vector<16x64xf32>
    %c120 = arith.constant 120 : index
    %c0_49 = arith.constant 0 : index
    %135 = vector.load %arg1[%c120, %c0_49] : memref<384x32xf32, #tpu.memory_space<vmem>>, vector<64x32xf32>
    %cst_50 = arith.constant dense<0.000000e+00> : vector<16x32xf32>
    %136 = tpu.matmul %134, %135, %cst_50 {dimension_numbers = #tpu.dot_dimension_numbers<[1], [0], [0], [1], [0, 0, 1, 1], [], []>} : vector<16x64xf32>, vector<64x32xf32>, vector<16x32xf32> -> vector<16x32xf32>
    %c366 = arith.constant 366 : index
    %c0_51 = arith.constant 0 : index
    %137 = vector.load %arg1[%c366, %c0_51] : memref<384x32xf32, #tpu.memory_space<vmem>>, vector<1x32xf32>
    %138 = vector.broadcast %137 : vector<1x32xf32> to vector<16x32xf32>
    %139 = arith.addf %136, %138 : vector<16x32xf32>
    %140 = arith.addf %139, %97 : vector<16x32xf32>
    %c184 = arith.constant 184 : index
    %c0_52 = arith.constant 0 : index
    %141 = vector.load %arg1[%c184, %c0_52] : memref<384x32xf32, #tpu.memory_space<vmem>>, vector<16x32xf32>
    %c0_53 = arith.constant 0 : index
    %c0_54 = arith.constant 0 : index
    %142 = vector.load %arg3[%c0_53, %c0_54] : memref<64x160xf32, #tpu.memory_space<vmem>>, vector<32x160xf32>
    %c370 = arith.constant 370 : index
    %c0_55 = arith.constant 0 : index
    %143 = vector.load %arg1[%c370, %c0_55] : memref<384x32xf32, #tpu.memory_space<vmem>>, vector<1x32xf32>
    %c371 = arith.constant 371 : index
    %c0_56 = arith.constant 0 : index
    %144 = vector.load %arg1[%c371, %c0_56] : memref<384x32xf32, #tpu.memory_space<vmem>>, vector<1x32xf32>
    %cst_57 = arith.constant dense<0.000000e+00> : vector<16xf32>
    %145 = vector.multi_reduction <add>, %140, %cst_57 [1] : vector<16x32xf32> to vector<16xf32>
    %146 = vector.shape_cast %145 : vector<16xf32> to vector<16x1xf32>
    %cst_58 = arith.constant 3.200000e+01 : f32
    %147 = vector.broadcast %cst_58 : f32 to vector<16x1xf32>
    %148 = arith.divf %146, %147 : vector<16x1xf32>
    %149 = vector.broadcast %148 : vector<16x1xf32> to vector<16x32xf32>
    %150 = arith.subf %140, %149 : vector<16x32xf32>
    %151 = arith.mulf %150, %150 : vector<16x32xf32>
    %cst_59 = arith.constant dense<0.000000e+00> : vector<16xf32>
    %152 = vector.multi_reduction <add>, %151, %cst_59 [1] : vector<16x32xf32> to vector<16xf32>
    %153 = vector.shape_cast %152 : vector<16xf32> to vector<16x1xf32>
    %cst_60 = arith.constant 3.200000e+01 : f32
    %154 = vector.broadcast %cst_60 : f32 to vector<16x1xf32>
    %155 = arith.divf %153, %154 : vector<16x1xf32>
    %156 = vector.broadcast %148 : vector<16x1xf32> to vector<16x32xf32>
    %157 = arith.subf %140, %156 : vector<16x32xf32>
    %cst_61 = arith.constant 9.99999974E-6 : f32
    %158 = vector.broadcast %cst_61 : f32 to vector<16x1xf32>
    %159 = arith.addf %155, %158 : vector<16x1xf32>
    %160 = math.rsqrt %159 : vector<16x1xf32>
    %161 = vector.broadcast %160 : vector<16x1xf32> to vector<16x32xf32>
    %162 = arith.mulf %157, %161 : vector<16x32xf32>
    %163 = vector.broadcast %143 : vector<1x32xf32> to vector<16x32xf32>
    %164 = arith.mulf %162, %163 : vector<16x32xf32>
    %165 = vector.broadcast %144 : vector<1x32xf32> to vector<16x32xf32>
    %166 = arith.addf %164, %165 : vector<16x32xf32>
    %cst_62 = arith.constant dense<0.000000e+00> : vector<16x160xf32>
    %167 = tpu.matmul %166, %142, %cst_62 {dimension_numbers = #tpu.dot_dimension_numbers<[1], [0], [0], [1], [0, 0, 1, 1], [], []>} : vector<16x32xf32>, vector<32x160xf32>, vector<16x160xf32> -> vector<16x160xf32>
    %168 = vector.extract_strided_slice %167 {offsets = [0, 0], sizes = [16, 32], strides = [1, 1]} : vector<16x160xf32> to vector<16x32xf32>
    %169 = vector.extract_strided_slice %167 {offsets = [0, 128], sizes = [16, 32], strides = [1, 1]} : vector<16x160xf32> to vector<16x32xf32>
    %170 = tpu.concatenate %168, %169 in 0 : vector<16x32xf32>, vector<16x32xf32> -> vector<32x32xf32>
    %cst_63 = arith.constant dense<0.000000e+00> : vector<16x32xf32>
    %171 = tpu.matmul %141, %170, %cst_63 {dimension_numbers = #tpu.dot_dimension_numbers<[1], [0], [0], [1], [0, 0, 1, 1], [], []>} : vector<16x32xf32>, vector<32x32xf32>, vector<16x32xf32> -> vector<16x32xf32>
    %172 = arith.addf %171, %140 : vector<16x32xf32>
    %c372 = arith.constant 372 : index
    %c0_64 = arith.constant 0 : index
    %173 = vector.load %arg1[%c372, %c0_64] : memref<384x32xf32, #tpu.memory_space<vmem>>, vector<1x32xf32>
    %c373 = arith.constant 373 : index
    %c0_65 = arith.constant 0 : index
    %174 = vector.load %arg1[%c373, %c0_65] : memref<384x32xf32, #tpu.memory_space<vmem>>, vector<1x32xf32>
    %cst_66 = arith.constant dense<0.000000e+00> : vector<16xf32>
    %175 = vector.multi_reduction <add>, %172, %cst_66 [1] : vector<16x32xf32> to vector<16xf32>
    %176 = vector.shape_cast %175 : vector<16xf32> to vector<16x1xf32>
    %cst_67 = arith.constant 3.200000e+01 : f32
    %177 = vector.broadcast %cst_67 : f32 to vector<16x1xf32>
    %178 = arith.divf %176, %177 : vector<16x1xf32>
    %179 = vector.broadcast %178 : vector<16x1xf32> to vector<16x32xf32>
    %180 = arith.subf %172, %179 : vector<16x32xf32>
    %181 = arith.mulf %180, %180 : vector<16x32xf32>
    %cst_68 = arith.constant dense<0.000000e+00> : vector<16xf32>
    %182 = vector.multi_reduction <add>, %181, %cst_68 [1] : vector<16x32xf32> to vector<16xf32>
    %183 = vector.shape_cast %182 : vector<16xf32> to vector<16x1xf32>
    %cst_69 = arith.constant 3.200000e+01 : f32
    %184 = vector.broadcast %cst_69 : f32 to vector<16x1xf32>
    %185 = arith.divf %183, %184 : vector<16x1xf32>
    %186 = vector.broadcast %178 : vector<16x1xf32> to vector<16x32xf32>
    %187 = arith.subf %172, %186 : vector<16x32xf32>
    %cst_70 = arith.constant 9.99999974E-6 : f32
    %188 = vector.broadcast %cst_70 : f32 to vector<16x1xf32>
    %189 = arith.addf %185, %188 : vector<16x1xf32>
    %190 = math.rsqrt %189 : vector<16x1xf32>
    %191 = vector.broadcast %190 : vector<16x1xf32> to vector<16x32xf32>
    %192 = arith.mulf %187, %191 : vector<16x32xf32>
    %193 = vector.broadcast %173 : vector<1x32xf32> to vector<16x32xf32>
    %194 = arith.mulf %192, %193 : vector<16x32xf32>
    %195 = vector.broadcast %174 : vector<1x32xf32> to vector<16x32xf32>
    %196 = arith.addf %194, %195 : vector<16x32xf32>
    %c32_71 = arith.constant 32 : index
    %c0_72 = arith.constant 0 : index
    %197 = vector.load %arg2[%c32_71, %c0_72] : memref<104x64xf32, #tpu.memory_space<vmem>>, vector<32x64xf32>
    %cst_73 = arith.constant dense<0.000000e+00> : vector<16x64xf32>
    %198 = tpu.matmul %196, %197, %cst_73 {dimension_numbers = #tpu.dot_dimension_numbers<[1], [0], [0], [1], [0, 0, 1, 1], [], []>} : vector<16x32xf32>, vector<32x64xf32>, vector<16x64xf32> -> vector<16x64xf32>
    %c97 = arith.constant 97 : index
    %c0_74 = arith.constant 0 : index
    %199 = vector.load %arg2[%c97, %c0_74] : memref<104x64xf32, #tpu.memory_space<vmem>>, vector<1x64xf32>
    %200 = vector.broadcast %199 : vector<1x64xf32> to vector<16x64xf32>
    %201 = arith.addf %198, %200 : vector<16x64xf32>
    %cst_75 = arith.constant 5.000000e-01 : f32
    %202 = vector.broadcast %cst_75 : f32 to vector<16x64xf32>
    %203 = arith.mulf %202, %201 : vector<16x64xf32>
    %cst_76 = arith.constant 0.707106769 : f32
    %204 = vector.broadcast %cst_76 : f32 to vector<16x64xf32>
    %205 = arith.mulf %201, %204 : vector<16x64xf32>
    %206 = math.erf %205 : vector<16x64xf32>
    %cst_77 = arith.constant 1.000000e+00 : f32
    %207 = vector.broadcast %cst_77 : f32 to vector<16x64xf32>
    %208 = arith.addf %207, %206 : vector<16x64xf32>
    %209 = arith.mulf %203, %208 : vector<16x64xf32>
    %c200 = arith.constant 200 : index
    %c0_78 = arith.constant 0 : index
    %210 = vector.load %arg1[%c200, %c0_78] : memref<384x32xf32, #tpu.memory_space<vmem>>, vector<64x32xf32>
    %cst_79 = arith.constant dense<0.000000e+00> : vector<16x32xf32>
    %211 = tpu.matmul %209, %210, %cst_79 {dimension_numbers = #tpu.dot_dimension_numbers<[1], [0], [0], [1], [0, 0, 1, 1], [], []>} : vector<16x64xf32>, vector<64x32xf32>, vector<16x32xf32> -> vector<16x32xf32>
    %c374 = arith.constant 374 : index
    %c0_80 = arith.constant 0 : index
    %212 = vector.load %arg1[%c374, %c0_80] : memref<384x32xf32, #tpu.memory_space<vmem>>, vector<1x32xf32>
    %213 = vector.broadcast %212 : vector<1x32xf32> to vector<16x32xf32>
    %214 = arith.addf %211, %213 : vector<16x32xf32>
    %215 = arith.addf %214, %172 : vector<16x32xf32>
    %c375 = arith.constant 375 : index
    %c0_81 = arith.constant 0 : index
    %216 = vector.load %arg1[%c375, %c0_81] : memref<384x32xf32, #tpu.memory_space<vmem>>, vector<1x32xf32>
    %c376 = arith.constant 376 : index
    %c0_82 = arith.constant 0 : index
    %217 = vector.load %arg1[%c376, %c0_82] : memref<384x32xf32, #tpu.memory_space<vmem>>, vector<1x32xf32>
    %cst_83 = arith.constant dense<0.000000e+00> : vector<16xf32>
    %218 = vector.multi_reduction <add>, %215, %cst_83 [1] : vector<16x32xf32> to vector<16xf32>
    %219 = vector.shape_cast %218 : vector<16xf32> to vector<16x1xf32>
    %cst_84 = arith.constant 3.200000e+01 : f32
    %220 = vector.broadcast %cst_84 : f32 to vector<16x1xf32>
    %221 = arith.divf %219, %220 : vector<16x1xf32>
    %222 = vector.broadcast %221 : vector<16x1xf32> to vector<16x32xf32>
    %223 = arith.subf %215, %222 : vector<16x32xf32>
    %224 = arith.mulf %223, %223 : vector<16x32xf32>
    %cst_85 = arith.constant dense<0.000000e+00> : vector<16xf32>
    %225 = vector.multi_reduction <add>, %224, %cst_85 [1] : vector<16x32xf32> to vector<16xf32>
    %226 = vector.shape_cast %225 : vector<16xf32> to vector<16x1xf32>
    %cst_86 = arith.constant 3.200000e+01 : f32
    %227 = vector.broadcast %cst_86 : f32 to vector<16x1xf32>
    %228 = arith.divf %226, %227 : vector<16x1xf32>
    %229 = vector.broadcast %221 : vector<16x1xf32> to vector<16x32xf32>
    %230 = arith.subf %215, %229 : vector<16x32xf32>
    %cst_87 = arith.constant 9.99999974E-6 : f32
    %231 = vector.broadcast %cst_87 : f32 to vector<16x1xf32>
    %232 = arith.addf %228, %231 : vector<16x1xf32>
    %233 = math.rsqrt %232 : vector<16x1xf32>
    %234 = vector.broadcast %233 : vector<16x1xf32> to vector<16x32xf32>
    %235 = arith.mulf %230, %234 : vector<16x32xf32>
    %236 = vector.broadcast %216 : vector<1x32xf32> to vector<16x32xf32>
    %237 = arith.mulf %235, %236 : vector<16x32xf32>
    %238 = vector.broadcast %217 : vector<1x32xf32> to vector<16x32xf32>
    %239 = arith.addf %237, %238 : vector<16x32xf32>
    %cst_88 = arith.constant dense<0.000000e+00> : vector<16x160xf32>
    %240 = tpu.matmul %239, %142, %cst_88 {dimension_numbers = #tpu.dot_dimension_numbers<[1], [0], [0], [1], [0, 0, 1, 1], [], []>} : vector<16x32xf32>, vector<32x160xf32>, vector<16x160xf32> -> vector<16x160xf32>
    %241 = vector.extract_strided_slice %240 {offsets = [0, 0], sizes = [16, 32], strides = [1, 1]} : vector<16x160xf32> to vector<16x32xf32>
    %242 = vector.extract_strided_slice %240 {offsets = [0, 128], sizes = [16, 32], strides = [1, 1]} : vector<16x160xf32> to vector<16x32xf32>
    %243 = tpu.concatenate %241, %242 in 0 : vector<16x32xf32>, vector<16x32xf32> -> vector<32x32xf32>
    %cst_89 = arith.constant dense<0.000000e+00> : vector<16x32xf32>
    %244 = tpu.matmul %141, %243, %cst_89 {dimension_numbers = #tpu.dot_dimension_numbers<[1], [0], [0], [1], [0, 0, 1, 1], [], []>} : vector<16x32xf32>, vector<32x32xf32>, vector<16x32xf32> -> vector<16x32xf32>
    %245 = arith.addf %244, %215 : vector<16x32xf32>
    %c377 = arith.constant 377 : index
    %c0_90 = arith.constant 0 : index
    %246 = vector.load %arg1[%c377, %c0_90] : memref<384x32xf32, #tpu.memory_space<vmem>>, vector<1x32xf32>
    %c378 = arith.constant 378 : index
    %c0_91 = arith.constant 0 : index
    %247 = vector.load %arg1[%c378, %c0_91] : memref<384x32xf32, #tpu.memory_space<vmem>>, vector<1x32xf32>
    %cst_92 = arith.constant dense<0.000000e+00> : vector<16xf32>
    %248 = vector.multi_reduction <add>, %245, %cst_92 [1] : vector<16x32xf32> to vector<16xf32>
    %249 = vector.shape_cast %248 : vector<16xf32> to vector<16x1xf32>
    %cst_93 = arith.constant 3.200000e+01 : f32
    %250 = vector.broadcast %cst_93 : f32 to vector<16x1xf32>
    %251 = arith.divf %249, %250 : vector<16x1xf32>
    %252 = vector.broadcast %251 : vector<16x1xf32> to vector<16x32xf32>
    %253 = arith.subf %245, %252 : vector<16x32xf32>
    %254 = arith.mulf %253, %253 : vector<16x32xf32>
    %cst_94 = arith.constant dense<0.000000e+00> : vector<16xf32>
    %255 = vector.multi_reduction <add>, %254, %cst_94 [1] : vector<16x32xf32> to vector<16xf32>
    %256 = vector.shape_cast %255 : vector<16xf32> to vector<16x1xf32>
    %cst_95 = arith.constant 3.200000e+01 : f32
    %257 = vector.broadcast %cst_95 : f32 to vector<16x1xf32>
    %258 = arith.divf %256, %257 : vector<16x1xf32>
    %259 = vector.broadcast %251 : vector<16x1xf32> to vector<16x32xf32>
    %260 = arith.subf %245, %259 : vector<16x32xf32>
    %cst_96 = arith.constant 9.99999974E-6 : f32
    %261 = vector.broadcast %cst_96 : f32 to vector<16x1xf32>
    %262 = arith.addf %258, %261 : vector<16x1xf32>
    %263 = math.rsqrt %262 : vector<16x1xf32>
    %264 = vector.broadcast %263 : vector<16x1xf32> to vector<16x32xf32>
    %265 = arith.mulf %260, %264 : vector<16x32xf32>
    %266 = vector.broadcast %246 : vector<1x32xf32> to vector<16x32xf32>
    %267 = arith.mulf %265, %266 : vector<16x32xf32>
    %268 = vector.broadcast %247 : vector<1x32xf32> to vector<16x32xf32>
    %269 = arith.addf %267, %268 : vector<16x32xf32>
    %c64 = arith.constant 64 : index
    %c0_97 = arith.constant 0 : index
    %270 = vector.load %arg2[%c64, %c0_97] : memref<104x64xf32, #tpu.memory_space<vmem>>, vector<32x64xf32>
    %cst_98 = arith.constant dense<0.000000e+00> : vector<16x64xf32>
    %271 = tpu.matmul %269, %270, %cst_98 {dimension_numbers = #tpu.dot_dimension_numbers<[1], [0], [0], [1], [0, 0, 1, 1], [], []>} : vector<16x32xf32>, vector<32x64xf32>, vector<16x64xf32> -> vector<16x64xf32>
    %c98 = arith.constant 98 : index
    %c0_99 = arith.constant 0 : index
    %272 = vector.load %arg2[%c98, %c0_99] : memref<104x64xf32, #tpu.memory_space<vmem>>, vector<1x64xf32>
    %273 = vector.broadcast %272 : vector<1x64xf32> to vector<16x64xf32>
    %274 = arith.addf %271, %273 : vector<16x64xf32>
    %cst_100 = arith.constant 5.000000e-01 : f32
    %275 = vector.broadcast %cst_100 : f32 to vector<16x64xf32>
    %276 = arith.mulf %275, %274 : vector<16x64xf32>
    %cst_101 = arith.constant 0.707106769 : f32
    %277 = vector.broadcast %cst_101 : f32 to vector<16x64xf32>
    %278 = arith.mulf %274, %277 : vector<16x64xf32>
    %279 = math.erf %278 : vector<16x64xf32>
    %cst_102 = arith.constant 1.000000e+00 : f32
    %280 = vector.broadcast %cst_102 : f32 to vector<16x64xf32>
    %281 = arith.addf %280, %279 : vector<16x64xf32>
    %282 = arith.mulf %276, %281 : vector<16x64xf32>
    %c264 = arith.constant 264 : index
    %c0_103 = arith.constant 0 : index
    %283 = vector.load %arg1[%c264, %c0_103] : memref<384x32xf32, #tpu.memory_space<vmem>>, vector<64x32xf32>
    %cst_104 = arith.constant dense<0.000000e+00> : vector<16x32xf32>
    %284 = tpu.matmul %282, %283, %cst_104 {dimension_numbers = #tpu.dot_dimension_numbers<[1], [0], [0], [1], [0, 0, 1, 1], [], []>} : vector<16x64xf32>, vector<64x32xf32>, vector<16x32xf32> -> vector<16x32xf32>
    %c379 = arith.constant 379 : index
    %c0_105 = arith.constant 0 : index
    %285 = vector.load %arg1[%c379, %c0_105] : memref<384x32xf32, #tpu.memory_space<vmem>>, vector<1x32xf32>
    %286 = vector.broadcast %285 : vector<1x32xf32> to vector<16x32xf32>
    %287 = arith.addf %284, %286 : vector<16x32xf32>
    %288 = arith.addf %287, %245 : vector<16x32xf32>
    %289 = vector.extract_strided_slice %288 {offsets = [0, 0], sizes = [8, 32], strides = [1, 1]} : vector<16x32xf32> to vector<8x32xf32>
    %cst_106 = arith.constant dense<0.000000e+00> : vector<32xf32>
    %290 = vector.multi_reduction <add>, %289, %cst_106 [0] : vector<8x32xf32> to vector<32xf32>
    %291 = vector.shape_cast %290 : vector<32xf32> to vector<1x32xf32>
    %cst_107 = arith.constant 8.000000e+00 : f32
    %292 = vector.broadcast %cst_107 : f32 to vector<1x32xf32>
    %293 = arith.divf %291, %292 : vector<1x32xf32>
    %294 = vector.extract_strided_slice %288 {offsets = [8, 0], sizes = [8, 32], strides = [1, 1]} : vector<16x32xf32> to vector<8x32xf32>
    %cst_108 = arith.constant dense<0.000000e+00> : vector<32xf32>
    %295 = vector.multi_reduction <add>, %294, %cst_108 [0] : vector<8x32xf32> to vector<32xf32>
    %296 = vector.shape_cast %295 : vector<32xf32> to vector<1x32xf32>
    %cst_109 = arith.constant 8.000000e+00 : f32
    %297 = vector.broadcast %cst_109 : f32 to vector<1x32xf32>
    %298 = arith.divf %296, %297 : vector<1x32xf32>
    %299 = tpu.concatenate %293, %298 in 0 : vector<1x32xf32>, vector<1x32xf32> -> vector<2x32xf32>
    %c367 = arith.constant 367 : index
    %c0_110 = arith.constant 0 : index
    %300 = vector.load %arg1[%c367, %c0_110] : memref<384x32xf32, #tpu.memory_space<vmem>>, vector<1x32xf32>
    %c368 = arith.constant 368 : index
    %c0_111 = arith.constant 0 : index
    %301 = vector.load %arg1[%c368, %c0_111] : memref<384x32xf32, #tpu.memory_space<vmem>>, vector<1x32xf32>
    %cst_112 = arith.constant dense<0.000000e+00> : vector<2xf32>
    %302 = vector.multi_reduction <add>, %299, %cst_112 [1] : vector<2x32xf32> to vector<2xf32>
    %303 = vector.shape_cast %302 : vector<2xf32> to vector<2x1xf32>
    %cst_113 = arith.constant 3.200000e+01 : f32
    %304 = vector.broadcast %cst_113 : f32 to vector<2x1xf32>
    %305 = arith.divf %303, %304 : vector<2x1xf32>
    %306 = vector.broadcast %305 : vector<2x1xf32> to vector<2x32xf32>
    %307 = arith.subf %299, %306 : vector<2x32xf32>
    %308 = arith.mulf %307, %307 : vector<2x32xf32>
    %cst_114 = arith.constant dense<0.000000e+00> : vector<2xf32>
    %309 = vector.multi_reduction <add>, %308, %cst_114 [1] : vector<2x32xf32> to vector<2xf32>
    %310 = vector.shape_cast %309 : vector<2xf32> to vector<2x1xf32>
    %cst_115 = arith.constant 3.200000e+01 : f32
    %311 = vector.broadcast %cst_115 : f32 to vector<2x1xf32>
    %312 = arith.divf %310, %311 : vector<2x1xf32>
    %313 = vector.broadcast %305 : vector<2x1xf32> to vector<2x32xf32>
    %314 = arith.subf %299, %313 : vector<2x32xf32>
    %cst_116 = arith.constant 9.99999974E-6 : f32
    %315 = vector.broadcast %cst_116 : f32 to vector<2x1xf32>
    %316 = arith.addf %312, %315 : vector<2x1xf32>
    %317 = math.rsqrt %316 : vector<2x1xf32>
    %318 = vector.broadcast %317 : vector<2x1xf32> to vector<2x32xf32>
    %319 = arith.mulf %314, %318 : vector<2x32xf32>
    %320 = vector.broadcast %300 : vector<1x32xf32> to vector<2x32xf32>
    %321 = arith.mulf %319, %320 : vector<2x32xf32>
    %322 = vector.broadcast %301 : vector<1x32xf32> to vector<2x32xf32>
    %323 = arith.addf %321, %322 : vector<2x32xf32>
    %cst_117 = arith.constant 5.000000e-01 : f32
    %324 = vector.broadcast %cst_117 : f32 to vector<2x32xf32>
    %325 = arith.mulf %324, %323 : vector<2x32xf32>
    %cst_118 = arith.constant 0.707106769 : f32
    %326 = vector.broadcast %cst_118 : f32 to vector<2x32xf32>
    %327 = arith.mulf %323, %326 : vector<2x32xf32>
    %328 = math.erf %327 : vector<2x32xf32>
    %cst_119 = arith.constant 1.000000e+00 : f32
    %329 = vector.broadcast %cst_119 : f32 to vector<2x32xf32>
    %330 = arith.addf %329, %328 : vector<2x32xf32>
    %331 = arith.mulf %325, %330 : vector<2x32xf32>
    %c328 = arith.constant 328 : index
    %c0_120 = arith.constant 0 : index
    %332 = vector.load %arg1[%c328, %c0_120] : memref<384x32xf32, #tpu.memory_space<vmem>>, vector<32x32xf32>
    %cst_121 = arith.constant dense<0.000000e+00> : vector<2x32xf32>
    %333 = tpu.matmul %331, %332, %cst_121 {dimension_numbers = #tpu.dot_dimension_numbers<[1], [0], [0], [1], [0, 0, 1, 1], [], []>} : vector<2x32xf32>, vector<32x32xf32>, vector<2x32xf32> -> vector<2x32xf32>
    %c369 = arith.constant 369 : index
    %c0_122 = arith.constant 0 : index
    %334 = vector.load %arg1[%c369, %c0_122] : memref<384x32xf32, #tpu.memory_space<vmem>>, vector<1x32xf32>
    %335 = vector.broadcast %334 : vector<1x32xf32> to vector<2x32xf32>
    %336 = arith.addf %333, %335 : vector<2x32xf32>
    %c0_123 = arith.constant 0 : index
    %c0_124 = arith.constant 0 : index
    %337 = vector.load %arg4[%c0_123, %c0_124] : memref<24x32xf32, #tpu.memory_space<vmem>>, vector<16x32xf32>
    tpu.vector_store %arg4[%c0_123, %c0_124], %288 {strides = array<i32>} : memref<24x32xf32, #tpu.memory_space<vmem>>, vector<16x32xf32>,
    %c16 = arith.constant 16 : index
    %c0_125 = arith.constant 0 : index
    %338 = vector.load %arg4[%c16, %c0_125] : memref<24x32xf32, #tpu.memory_space<vmem>>, vector<2x32xf32>
    tpu.vector_store %arg4[%c16, %c0_125], %336 {strides = array<i32>} : memref<24x32xf32, #tpu.memory_space<vmem>>, vector<2x32xf32>,
    return
  }
}

</mosaic_0001>

<bundles_post_ra>
// kernel: forward.1
= control target key start
LH: loop header
LB: loop body
LE: loop exit
PB: predicated region body
PF: predicated region fallthrough
CT: control target
= control target key end

     0   :  { %vm26_vm0 = vcmask 64512   ;;  %vm72_vm1 = vcmask 261120   ;;  %v1723_v25 = vmov 32.0   ;;  %s2364_s1 = inlined_call_operand.vmem [shape: f32[384,32], index: 1, kind: input, shape index: {}]   ;;  %s2365_s0 = inlined_call_operand.vmem [shape: f32[32,8], index: 0, kind: input, shape index: {}]   ;;  %s2366_s3 = inlined_call_operand.vmem [shape: f32[64,160], index: 3, kind: input, shape index: {}]   ;;  %s2367_s2 = inlined_call_operand.vmem [shape: f32[104,64], index: 2, kind: input, shape index: {}]   ;;  %s2368_s4 = inlined_call_operand.vmem [shape: f32[24,32], index: 4, kind: output, shape index: {}]  }
   0x1   :  { %v21_v0 = vld [vmem:[%s2364_s1] sm:$0xff]  ;;  %v18_v2 = vld [vmem:[%s2365_s0 + $0x8] sm:$0xff]  ;;  %v19_v3 = vld [vmem:[%s2365_s0 + $0x10] sm:$0xff]  ;;  %1663 = vrcp.f32 %v1723_v25 }
   0x2   :  { %v17_v1 = vld [vmem:[%s2365_s0] sm:$0xff]  ;;  %54 = vmatpush.msra.mxu0 %v21_v0  ;;  %v20_v4 = vld [vmem:[%s2365_s0 + $0x18] sm:$0xff]  ;;  %v1768_v5 = vld [vmem:[%s2364_s1 + $0x28] sm:$0xff] }
   0x3   :  { %1582 = vmatmul.msk.f32.vlgmr.msra.gmra.mxu0 %vm26_vm0, %v17_v1  ;;  %v73_v6 = vsel %vm72_vm1, %v1768_v5, 0.0  ;;  %v1775_v7 = vld [vmem:[%s2364_s1 + $0x30] sm:$0xff]  ;;  %v22_v9 = vld [vmem:[%s2364_s1 + $0x8] sm:$0xff]  ;;  %v24_v17 = vld [vmem:[%s2364_s1 + $0x18] sm:$0xff] }
   0x4   :  { %74 = vadd.xlane.f32.xlu2 %v73_v6  ;;  %v76_v8 = vsel %vm72_vm1, %v1775_v7, 0.0  ;;  %v23_v13 = vld [vmem:[%s2364_s1 + $0x10] sm:$0xff]  ;;  %v25_v21 = vld [vmem:[%s2364_s1 + $0x20] sm:$0xff]  ;;  %v270_v63 = vld [vmem:[%s2366_s3 + $0x78] sm:$0xff] }
   0x5   :  { %v269_v62 = vld [vmem:[%s2366_s3 + $0x70] sm:$0xff]  ;;  %324 = vmatpush.msra.mxu3 %v270_v63  ;;  %v267_v0 = vld [vmem:[%s2366_s3 + $0x60] sm:$0xff]  ;;  %v268_v1 = vld [vmem:[%s2366_s3 + $0x68] sm:$0xff] }
   0x6   :  { %295 = vmatpush.msra.mxu2 %v269_v62  ;;  %v264_v6 = vld [vmem:[%s2366_s3 + $0x48] sm:$0xff] }
   0x7   :  { %v1664_v26 = vpop.eup %1663  ;;  %325 = vmatpush.msra.mxu3 %v268_v1 }
   0x8   :  { %v80_v27 = vmul.f32 32.0, %v1664_v26  ;;  %vm84_vm2 = vweird.f32 %v1664_v26  ;;  %296 = vmatpush.msra.mxu2 %v267_v0 }
   0xa   :  { %v81_v28 = vsub.f32 1.0, %v80_v27 }
   0xb   :  { %1583 = vmatmul.msk.f32.gmra.mxu0 %vm26_vm0, %v18_v2  ;;  %v265_v2 = vld [vmem:[%s2366_s3 + $0x50] sm:$0xff] }
   0xc   :  { %77 = vadd.xlane.f32.xlu2 %v76_v8  ;;  %v82_v29 = vmul.f32 %v1664_v26, %v81_v28  ;;  %297 = vmatpush.msra.mxu2 %v265_v2 }
   0xe   :  { %v83_v30 = vadd.f32 %v1664_v26, %v82_v29 }
  0x10   :  { %v1795_v31 = vsel %vm84_vm2, %v1664_v26, %v83_v30 }
  0x13   :  { %1584 = vmatmul.msk.f32.gmra.mxu0 %vm26_vm0, %v19_v3  ;;  %v266_v3 = vld [vmem:[%s2366_s3 + $0x58] sm:$0xff] }
  0x14   :  { %326 = vmatpush.msra.mxu3 %v266_v3 }
  0x16   :  { %327 = vmatpush.msra.mxu3 %v264_v6 }
  0x1b   :  { %1585 = vmatmul.msk.f32.gmra.mxu0 %vm26_vm0, %v20_v4  ;;  %v263_v4 = vld [vmem:[%s2366_s3 + $0x40] sm:$0xff] }
  0x1c   :  { %298 = vmatpush.msra.mxu2 %v263_v4 }
  0x77   :  { %v75_v35 = vpop.xlane.xlu2 %74 }
  0x78   :  { %v86_v40 = vmul.f32 %v1795_v31, %v75_v35 }
  0x7a   :  { %v1808_v42 = vsub.f32 %v1768_v5, %v86_v40 }
  0x7c   :  { %v90_v49 = vmul.f32 %v1808_v42, %v1808_v42 }
  0x7e   :  { %v92_v53 = vsel %vm72_vm1, %v90_v49, 0.0 }
  0x7f   :  { %v78_v44 = vpop.xlane.xlu2 %77 }
  0x80   :  { %v56_v10 = vpop.f32.mrf.mxu0  ;;  %v87_v48 = vmul.f32 %v1795_v31, %v78_v44 }
  0x81   :  { %v57_v11 = vadd.f32 %v56_v10, %v22_v9 }
  0x82   :  { %v1820_v51 = vsub.f32 %v1775_v7, %v87_v48 }
  0x83   :  { %v132_v12 = vsel %vm72_vm1, %v57_v11, 0.0 }
  0x84   :  { %133 = vadd.xlane.f32.xlu0 %v132_v12  ;;  %v91_v57 = vmul.f32 %v1820_v51, %v1820_v51 }
  0x86   :  { %v95_v59 = vsel %vm72_vm1, %v91_v57, 0.0 }
  0x88   :  { %v59_v14 = vpop.f32.mrf.mxu0 }
  0x89   :  { %v60_v15 = vadd.f32 %v59_v14, %v23_v13  ;;  %v232_v13 = vld [vmem:[%s2364_s1 + $0x48] sm:$0xff] }
  0x8b   :  { %v135_v16 = vsel %vm72_vm1, %v60_v15, 0.0 }
  0x8c   :  { %136 = vadd.xlane.f32.xlu0 %v135_v16 }
  0x90   :  { %v62_v18 = vpop.f32.mrf.mxu0 }
  0x91   :  { %v63_v19 = vadd.f32 %v62_v18, %v24_v17 }
  0x93   :  { %v138_v20 = vsel %vm72_vm1, %v63_v19, 0.0 }
  0x94   :  { %139 = vadd.xlane.f32.xlu1 %v138_v20 }
  0x98   :  { %v65_v22 = vpop.f32.mrf.mxu0 }
  0x99   :  { %v66_v23 = vadd.f32 %v65_v22, %v25_v21 }
  0x9b   :  { %v141_v24 = vsel %vm72_vm1, %v66_v23, 0.0 }
  0x9c   :  { %142 = vadd.xlane.f32.xlu1 %v141_v24 }
  0xf7   :  { %v134_v32 = vpop.xlane.xlu0 %133 }
  0xf8   :  { %v144_v33 = vmul.f32 %v134_v32, %v1795_v31 }
  0xfa   :  { %v1798_v34 = vsub.f32 %v57_v11, %v144_v33  ;;  %v233_v11 = vld [vmem:[%s2364_s1 + $0x50] sm:$0xff]  ;;  %v1878_v33 = vld [vmem:[%s2364_s1 + $0x16a] ss:$0 sm:$0xff] }
  0xfb   :  { %252 = vmatpush.msra.mxu1 %v233_v11 }
  0xfc   :  { %v152_v36 = vmul.f32 %v1798_v34, %v1798_v34 }
  0xfd   :  { %253 = vmatpush.msra.mxu1 %v232_v13  ;;  %v1642_v13 = vld [vmem:[%s2364_s1 + $0x168] ss:$0 sm:$0xff] }
  0xfe   :  { %v156_v37 = vsel %vm72_vm1, %v152_v36, 0.0 }
  0xff   :  { %157 = vadd.xlane.f32.xlu0 %v156_v37  ;;  %v137_v38 = vpop.xlane.xlu0 %136 }
 0x100   :  { %v145_v39 = vmul.f32 %v137_v38, %v1795_v31  ;;  %v1884_v38 = vld [vmem:[%s2364_s1 + $0x16b] ss:$0 sm:$0xff] }
 0x102   :  { %v1805_v41 = vsub.f32 %v60_v15, %v145_v39  ;;  %v231_v15 = vld [vmem:[%s2364_s1 + $0x40] sm:$0xff] }
 0x103   :  { %254 = vmatpush.msra.mxu1 %v231_v15 }
 0x104   :  { %v153_v43 = vmul.f32 %v1805_v41, %v1805_v41 }
 0x106   :  { %v159_v45 = vsel %vm72_vm1, %v153_v43, 0.0 }
 0x107   :  { %v140_v46 = vpop.xlane.xlu1 %139  ;;  %160 = vadd.xlane.f32.xlu1 %v159_v45 }
 0x108   :  { %v146_v47 = vmul.f32 %v140_v46, %v1795_v31 }
 0x10a   :  { %v1817_v50 = vsub.f32 %v63_v19, %v146_v47  ;;  %v230_v19 = vld [vmem:[%s2364_s1 + $0x38] sm:$0xff] }
 0x10b   :  { %255 = vmatpush.msra.mxu1 %v230_v19  ;;  %v1643_v19 = vld [vmem:[%s2364_s1 + $0x169] ss:$0 sm:$0xff] }
 0x10c   :  { %v154_v52 = vmul.f32 %v1817_v50, %v1817_v50 }
 0x10e   :  { %v162_v54 = vsel %vm72_vm1, %v154_v52, 0.0 }
 0x10f   :  { %163 = vadd.xlane.f32.xlu2 %v162_v54  ;;  %v143_v55 = vpop.xlane.xlu1 %142  ;;  %93 = vadd.xlane.f32.xlu1 %v92_v53 }
 0x110   :  { %v147_v56 = vmul.f32 %v143_v55, %v1795_v31 }
 0x112   :  { %v1829_v58 = vsub.f32 %v66_v23, %v147_v56 }
 0x114   :  { %v155_v60 = vmul.f32 %v1829_v58, %v1829_v58 }
 0x116   :  { %v165_v61 = vsel %vm72_vm1, %v155_v60, 0.0 }
 0x117   :  { %96 = vadd.xlane.f32.xlu2 %v95_v59  ;;  %166 = vadd.xlane.f32.xlu0 %v165_v61 }
 0x172   :  { %v158_v8 = vpop.xlane.xlu0 %157 }
 0x173   :  { %v168_v9 = vmul.f32 %v158_v8, %v1795_v31 }
 0x175   :  { %v172_v10 = vadd.f32 1e-05, %v168_v9 }
 0x177   :  { %1665 = vrsqrt.f32 %v172_v10  ;;  %vm182_vm4 = vweird.f32 %v172_v10 }
 0x17a   :  { %v161_v12 = vpop.xlane.xlu1 %160 }
 0x17b   :  { %v169_v14 = vmul.f32 %v161_v12, %v1795_v31 }
 0x17d   :  { %v1666_v16 = vpop.eup %1665  ;;  %v173_v17 = vadd.f32 1e-05, %v169_v14 }
 0x17e   :  { %v177_v18 = vmul.f32 %v1666_v16, %v172_v10  ;;  %vm183_vm3 = vweird.f32 %v1666_v16 }
 0x17f   :  { %1667 = vrsqrt.f32 %v173_v17  ;;  %vm184_vm5 = vmor %vm182_vm4, %vm183_vm3  ;;  %vm192_vm7 = vweird.f32 %v173_v17 }
 0x180   :  { %v178_v20 = vmul.f32 %v1666_v16, %v177_v18 }
 0x182   :  { %v179_v21 = vmul.f32 0.5, %v178_v20  ;;  %v164_v22 = vpop.xlane.xlu2 %163  ;;  %v94_v23 = vpop.xlane.xlu1 %93 }
 0x183   :  { %v170_v24 = vmul.f32 %v164_v22, %v1795_v31  ;;  %v98_v25 = vmul.f32 %v94_v23, %v1795_v31 }
 0x184   :  { %v180_v26 = vsub.f32 1.5, %v179_v21 }
 0x185   :  { %v1668_v27 = vpop.eup %1667  ;;  %v174_v28 = vadd.f32 1e-05, %v170_v24  ;;  %v100_v29 = vadd.f32 1e-05, %v98_v25 }
 0x186   :  { %v181_v30 = vmul.f32 %v1666_v16, %v180_v26  ;;  %v187_v32 = vmul.f32 %v1668_v27, %v173_v17  ;;  %vm193_vm6 = vweird.f32 %v1668_v27 }
 0x187   :  { %1669 = vrsqrt.f32 %v174_v28  ;;  %vm194_vm8 = vmor %vm192_vm7, %vm193_vm6  ;;  %vm108_vm10 = vweird.f32 %v100_v29  ;;  %vm202_vm12 = vweird.f32 %v174_v28  ;;  %vm371_vm6 = vcmask 130048  }
 0x188   :  { %v185_v35 = vsel %vm184_vm5, %v1666_v16, %v181_v30  ;;  %v188_v36 = vmul.f32 %v1668_v27, %v187_v32  ;;  %1671 = vrsqrt.f32 %v100_v29 }
 0x189   :  { %v216_v37 = vmul.f32 %v185_v35, %v1798_v34 }
 0x18a   :  { %v189_v39 = vmul.f32 0.5, %v188_v36  ;;  %v97_v40 = vpop.xlane.xlu2 %96  ;;  %v167_v43 = vpop.xlane.xlu0 %166 }
 0x18b   :  { %v99_v44 = vmul.f32 %v97_v40, %v1795_v31  ;;  %v171_v45 = vmul.f32 %v167_v43, %v1795_v31  ;;  %v221_v46 = vmul.f32 %v1878_v33, %v216_v37 }
 0x18c   :  { %v190_v47 = vsub.f32 1.5, %v189_v39 }
 0x18d   :  { %v1670_v48 = vpop.eup %1669  ;;  %v101_v49 = vadd.f32 1e-05, %v99_v44  ;;  %v1889_v52 = vadd.f32 1e-05, %v171_v45  ;;  %v226_v34 = vadd.f32 %v1884_v38, %v221_v46 }
 0x18e   :  { %v1672_v53 = vpop.eup %1671  ;;  %v191_v54 = vmul.f32 %v1668_v27, %v190_v47  ;;  %v197_v55 = vmul.f32 %v1670_v48, %v174_v28  ;;  %vm203_vm9 = vweird.f32 %v1670_v48 }
 0x18f   :  { %v103_v56 = vmul.f32 %v1672_v53, %v100_v29  ;;  %1673 = vrsqrt.f32 %v101_v49  ;;  %1588 = vmatmul.msk.f32.vlgmr.msra.gmra.mxu2 %vm72_vm1, %v226_v34  ;;  %1592 = vmatmul.msk.f32.vlgmr.msra.gmra.mxu3 %vm72_vm1, %v226_v34  ;;  %vm109_vm11 = vweird.f32 %v1672_v53  ;;  %vm204_vm13 = vmor %vm202_vm12, %vm203_vm9  ;;  %vm118_vm15 = vweird.f32 %v101_v49 }
 0x190   :  { %v195_v57 = vsel %vm194_vm8, %v1668_v27, %v191_v54  ;;  %v198_v59 = vmul.f32 %v1670_v48, %v197_v55  ;;  %1675 = vrsqrt.f32 %v1889_v52  ;;  %vm110_vm14 = vmor %vm108_vm10, %vm109_vm11  ;;  %vm212_vm4 = vweird.f32 %v1889_v52 }
 0x191   :  { %v104_v60 = vmul.f32 %v1672_v53, %v103_v56  ;;  %v217_v61 = vmul.f32 %v195_v57, %v1805_v41 }
 0x192   :  { %v199_v62 = vmul.f32 0.5, %v198_v59 }
 0x193   :  { %v105_v63 = vmul.f32 0.5, %v104_v60  ;;  %v222_v0 = vmul.f32 %v1878_v33, %v217_v61 }
 0x194   :  { %v200_v1 = vsub.f32 1.5, %v199_v62 }
 0x195   :  { %v1674_v2 = vpop.eup %1673  ;;  %v106_v3 = vsub.f32 1.5, %v105_v63  ;;  %v227_v4 = vadd.f32 %v1884_v38, %v222_v0 }
 0x196   :  { %v1676_v6 = vpop.eup %1675  ;;  %v201_v8 = vmul.f32 %v1670_v48, %v200_v1  ;;  %v113_v9 = vmul.f32 %v1674_v2, %v101_v49  ;;  %vm119_vm0 = vweird.f32 %v1674_v2 }
 0x197   :  { %v107_v10 = vmul.f32 %v1672_v53, %v106_v3  ;;  %v207_v41 = vmul.f32 %v1676_v6, %v1889_v52  ;;  %1589 = vmatmul.msk.f32.gmra.mxu2 %vm72_vm1, %v227_v4  ;;  %1593 = vmatmul.msk.f32.gmra.mxu3 %vm72_vm1, %v227_v4  ;;  %vm213_vm2 = vweird.f32 %v1676_v6  ;;  %vm120_vm3 = vmor %vm118_vm15, %vm119_vm0  ;;  %v498_v3 = vld [vmem:[%s2364_s1 + $0x68] sm:$0xff] }
 0x198   :  { %v205_v11 = vsel %vm204_vm13, %v1670_v48, %v201_v8  ;;  %v114_v12 = vmul.f32 %v1674_v2, %v113_v9  ;;  %vm214_vm5 = vmor %vm212_vm4, %vm213_vm2 }
 0x199   :  { %v111_v14 = vsel %vm110_vm14, %v1672_v53, %v107_v10  ;;  %v208_v15 = vmul.f32 %v1676_v6, %v207_v41  ;;  %v218_v16 = vmul.f32 %v205_v11, %v1817_v50 }
 0x19a   :  { %v115_v17 = vmul.f32 0.5, %v114_v12  ;;  %v122_v18 = vmul.f32 %v111_v14, %v1808_v42 }
 0x19b   :  { %v209_v20 = vmul.f32 0.5, %v208_v15  ;;  %v223_v21 = vmul.f32 %v1878_v33, %v218_v16 }
 0x19c   :  { %v116_v22 = vsub.f32 1.5, %v115_v17  ;;  %v125_v23 = vmul.f32 %v1642_v13, %v122_v18 }
 0x19d   :  { %v210_v24 = vsub.f32 1.5, %v209_v20  ;;  %v228_v25 = vadd.f32 %v1884_v38, %v223_v21 }
 0x19e   :  { %v117_v26 = vmul.f32 %v1674_v2, %v116_v22  ;;  %v128_v50 = vadd.f32 %v1643_v19, %v125_v23 }
 0x19f   :  { %v211_v27 = vmul.f32 %v1676_v6, %v210_v24  ;;  %1590 = vmatmul.msk.f32.gmra.mxu2 %vm72_vm1, %v228_v25  ;;  %1594 = vmatmul.msk.f32.gmra.mxu3 %vm72_vm1, %v228_v25 }
 0x1a0   :  { %v121_v42 = vsel %vm120_vm3, %v1674_v2, %v117_v26  ;;  %1586 = vmatmul.msk.f32.vlgmr.msra.gmra.mxu1 %vm72_vm1, %v128_v50  ;;  %v499_v2 = vld [vmem:[%s2364_s1 + $0x70] sm:$0xff] }
 0x1a1   :  { %v215_v28 = vsel %vm214_vm5, %v1676_v6, %v211_v27  ;;  %v123_v29 = vmul.f32 %v121_v42, %v1820_v51  ;;  %518 = vmatpush.msrb.mxu2 %v499_v2  ;;  %v497_v6 = vld [vmem:[%s2364_s1 + $0x60] sm:$0xff]  ;;  %v496_v42 = vld [vmem:[%s2364_s1 + $0x58] sm:$0xff] }
 0x1a2   :  { %v219_v30 = vmul.f32 %v215_v28, %v1829_v58 }
 0x1a3   :  { %v126_v32 = vmul.f32 %v1642_v13, %v123_v29  ;;  %519 = vmatpush.msrb.mxu2 %v498_v3  ;;  %v1645_v3 = vld [vmem:[%s2364_s1 + $0x16d] ss:$0 sm:$0xff] }
 0x1a4   :  { %v224_v35 = vmul.f32 %v1878_v33, %v219_v30 }
 0x1a5   :  { %v129_v36 = vadd.f32 %v1643_v19, %v126_v32  ;;  %520 = vmatpush.msrb.mxu2 %v497_v6 }
 0x1a6   :  { %v229_v37 = vadd.f32 %v1884_v38, %v224_v35 }
 0x1a7   :  { %521 = vmatpush.msrb.mxu2 %v496_v42  ;;  %v709_v42 = vld [vmem:[%s2364_s1 + $0xa0] sm:$0xff] }
 0x1a8   :  { %1587 = vmatmul.msk.f32.gmra.mxu1 %vm72_vm1, %v129_v36  ;;  %1591 = vmatmul.msk.f32.gmra.mxu2 %vm72_vm1, %v229_v37 }
 0x1a9   :  { %1595 = vmatmul.msk.f32.gmra.mxu3 %vm72_vm1, %v229_v37 }
 0x212   :  { %v300_v39 = vpop.f32.mrf.mxu2  ;;  %v329_v40 = vpop.f32.mrf.mxu3 }
 0x21a   :  { %v303_v43 = vpop.f32.mrf.mxu2  ;;  %v332_v44 = vpop.f32.mrf.mxu3 }
 0x21b   :  { %1596 = vmatpush.xpose.msk.msrb.mxu1 %vm72_vm1, %v303_v43 }
 0x21d   :  { %v257_v51 = vpop.f32.mrf.mxu1 }
 0x21f   :  { %1597 = vmatpush.xpose.msk.msrb.mxu1 %vm72_vm1, %v300_v39 }
 0x222   :  { %v306_v58 = vpop.f32.mrf.mxu2  ;;  %v335_v33 = vpop.f32.mrf.mxu3  ;;  %1598 = vmatmul.msk.f32.vlgmr.msrb.gmra.mxu1 %vm72_vm1, %v257_v51 }
 0x223   :  { %413 = vmatpush.msra.mxu1 %v332_v44 }
 0x225   :  { %414 = vmatpush.msra.mxu1 %v329_v40  ;;  %v260_v46 = vpop.f32.mrf.mxu1 }
 0x22b   :  { %v309_v38 = vpop.f32.mrf.mxu2 }
 0x22c   :  { %v338_v45 = vpop.f32.mrf.mxu3  ;;  %1600 = vmatpush.xpose.msk.msrb.mxu0 %vm72_vm1, %v309_v38 }
 0x22d   :  { %490 = vmatpush.msrb.mxu1 %v338_v45 }
 0x22f   :  { %491 = vmatpush.msrb.mxu1 %v335_v33 }
 0x230   :  { %1601 = vmatpush.xpose.msk.msrb.mxu0 %vm72_vm1, %v306_v58 }
 0x233   :  { %1602 = vmatmul.msk.f32.vlgmr.msrb.gmra.mxu0 %vm72_vm1, %v260_v46  ;;  %v584_v46 = vld [vmem:[%s2367_s2 + $0x18] sm:$0xff] }
 0x234   :  { %605 = vmatpush.msrb.mxu3 %v584_v46  ;;  %v704_v46 = vld [vmem:[%s2364_s1 + $0x78] sm:$0xff] }
 0x29f   :  { %v367_v47 = vpop.f32.mrf.mxu1 }
 0x2a0   :  { %v370_v48 = vmul.f32 0.17677669, %v367_v47  ;;  %v583_v47 = vld [vmem:[%s2367_s2 + $0x10] sm:$0xff] }
 0x2a1   :  { %606 = vmatpush.msrb.mxu3 %v583_v47 }
 0x2a2   :  { %v372_v49 = vsel %vm371_vm6, %v370_v48, -inf }
 0x2a3   :  { %373 = vmax.xlane.f32.xlu0 %v372_v49  ;;  %v581_v49 = vld [vmem:[%s2367_s2] sm:$0xff] }
 0x2b0   :  { %v445_v52 = vpop.f32.mrf.mxu0 }
 0x2b1   :  { %v448_v34 = vmul.f32 0.17677669, %v445_v52 }
 0x2b3   :  { %v449_v53 = vsel %vm371_vm6, %v448_v34, -inf }
 0x2b4   :  { %450 = vmax.xlane.f32.xlu1 %v449_v53 }
 0x316   :  { %v374_v54 = vpop.xlane.xlu0 %373 }
 0x317   :  { %v375_v55 = vsub.f32 %v370_v48, %v374_v54  ;;  %v582_v48 = vld [vmem:[%s2367_s2 + $0x8] sm:$0xff] }
 0x318   :  { %607 = vmatpush.msrb.mxu3 %v582_v48 }
 0x319   :  { %v376_v56 = vmul.f32 1.442695, %v375_v55 }
 0x31a   :  { %608 = vmatpush.msrb.mxu3 %v581_v49 }
 0x31b   :  { %1677 = vpow2.f32 %v376_v56 }
 0x321   :  { %v1678_v57 = vpop.eup %1677 }
 0x322   :  { %v378_v59 = vsel %vm371_vm6, %v1678_v57, 0.0 }
 0x323   :  { %379 = vadd.xlane.f32.xlu2 %v378_v59 }
 0x327   :  { %v451_v60 = vpop.xlane.xlu1 %450 }
 0x328   :  { %v452_v61 = vsub.f32 %v448_v34, %v451_v60 }
 0x32a   :  { %v453_v62 = vmul.f32 1.442695, %v452_v61 }
 0x32c   :  { %1679 = vpow2.f32 %v453_v62 }
 0x332   :  { %v1680_v63 = vpop.eup %1679 }
 0x333   :  { %v455_v0 = vsel %vm371_vm6, %v1680_v63, 0.0 }
 0x334   :  { %456 = vadd.xlane.f32.xlu0 %v455_v0  ;;  %v1644_v0 = vld [vmem:[%s2364_s1 + $0x16c] ss:$0 sm:$0xff] }
 0x396   :  { %v380_v1 = vpop.xlane.xlu2 %379 }
 0x397   :  { %1681 = vrcp.f32 %v380_v1  ;;  %v392_v10 = vand.u32 2147483648, %v380_v1  ;;  %v390_v11 = vand.u32 2147483647, %v380_v1  ;;  %vm386_vm8 = vweird.f32 %v380_v1 }
 0x399   :  { %v393_v13 = vor.u32 1.1754944e-38, %v392_v10  ;;  %vm391_vm10 = vcmp.eq.f32.partialorder %v390_v11, 8.507059e+37 }
 0x39d   :  { %v1682_v4 = vpop.eup %1681 }
 0x39e   :  { %v382_v8 = vmul.f32 %v1682_v4, %v380_v1  ;;  %vm387_vm7 = vweird.f32 %v1682_v4 }
 0x39f   :  { %vm388_vm9 = vmor %vm386_vm8, %vm387_vm7 }
 0x3a0   :  { %v383_v9 = vsub.f32 1.0, %v382_v8 }
 0x3a2   :  { %v384_v41 = vmul.f32 %v1682_v4, %v383_v9 }
 0x3a4   :  { %v385_v12 = vadd.f32 %v1682_v4, %v384_v41 }
 0x3a6   :  { %v389_v14 = vsel %vm388_vm9, %v1682_v4, %v385_v12 }
 0x3a7   :  { %v394_v15 = vsel %vm391_vm10, %v393_v13, %v389_v14  ;;  %v457_v16 = vpop.xlane.xlu0 %456  ;;  %vm714_vm10 = vcmask 523264  }
 0x3a8   :  { %1683 = vrcp.f32 %v457_v16  ;;  %v395_v17 = vmul.f32 %v1678_v57, %v394_v15  ;;  %v469_v21 = vand.u32 2147483648, %v457_v16  ;;  %v467_v23 = vand.u32 2147483647, %v457_v16 }
 0x3a9   :  { %vm463_vm12 = vweird.f32 %v457_v16 }
 0x3aa   :  { %1599 = vmatmul.msk.f32.vlgmr.msra.gmra.mxu1 %vm371_vm6, %v395_v17  ;;  %v470_v25 = vor.u32 1.1754944e-38, %v469_v21  ;;  %vm468_vm14 = vcmp.eq.f32.partialorder %v467_v23, 8.507059e+37  ;;  %v1646_v17 = vld [vmem:[%s2367_s2 + $0x60] ss:$0 sm:$0xff]  ;;  %v711_v23 = vld [vmem:[%s2364_s1 + $0xb0] sm:$0xff] }
 0x3ab   :  { %729 = vmatpush.msra.mxu0 %v711_v23 }
 0x3ae   :  { %v1684_v18 = vpop.eup %1683 }
 0x3af   :  { %v459_v19 = vmul.f32 %v1684_v18, %v457_v16  ;;  %vm464_vm11 = vweird.f32 %v1684_v18 }
 0x3b0   :  { %vm465_vm13 = vmor %vm463_vm12, %vm464_vm11 }
 0x3b1   :  { %v460_v20 = vsub.f32 1.0, %v459_v19 }
 0x3b3   :  { %v461_v22 = vmul.f32 %v1684_v18, %v460_v20 }
 0x3b5   :  { %v462_v24 = vadd.f32 %v1684_v18, %v461_v22 }
 0x3b7   :  { %v466_v26 = vsel %vm465_vm13, %v1684_v18, %v462_v24 }
 0x3b8   :  { %v471_v50 = vsel %vm468_vm14, %v470_v25, %v466_v26  ;;  %v710_v26 = vld [vmem:[%s2364_s1 + $0xa8] sm:$0xff] }
 0x3b9   :  { %v472_v27 = vmul.f32 %v1680_v63, %v471_v50  ;;  %730 = vmatpush.msra.mxu0 %v710_v26 }
 0x3bb   :  { %1603 = vmatmul.msk.f32.vlgmr.msrb.gmra.mxu1 %vm371_vm6, %v472_v27  ;;  %731 = vmatpush.msra.mxu0 %v709_v42 }
 0x427   :  { %v416_v28 = vpop.f32.mrf.mxu1 }
 0x428   :  { %1604 = vmatmul.msk.f32.vlgmr.msrb.gmra.mxu2 %vm72_vm1, %v416_v28 }
 0x438   :  { %v493_v29 = vpop.f32.mrf.mxu1 }
 0x439   :  { %1605 = vmatmul.msk.f32.gmra.mxu2 %vm72_vm1, %v493_v29 }
 0x4ab   :  { %v523_v30 = vpop.f32.mrf.mxu2 }
 0x4ac   :  { %v1949_v32 = vadd.f32 %v523_v30, %v1768_v5  ;;  %v708_v30 = vld [vmem:[%s2364_s1 + $0x98] sm:$0xff] }
 0x4ad   :  { %732 = vmatpush.msra.mxu0 %v708_v30 }
 0x4ae   :  { %v531_v35 = vsel %vm72_vm1, %v1949_v32, 0.0 }
 0x4af   :  { %532 = vadd.xlane.f32.xlu1 %v531_v35 }
 0x4bc   :  { %v526_v36 = vpop.f32.mrf.mxu2 }
 0x4bd   :  { %v1954_v37 = vadd.f32 %v526_v36, %v1775_v7 }
 0x4bf   :  { %v534_v39 = vsel %vm72_vm1, %v1954_v37, 0.0 }
 0x4c0   :  { %535 = vadd.xlane.f32.xlu2 %v534_v39 }
 0x522   :  { %v533_v40 = vpop.xlane.xlu1 %532 }
 0x523   :  { %v537_v43 = vmul.f32 %v533_v40, %v1795_v31  ;;  %v707_v40 = vld [vmem:[%s2364_s1 + $0x90] sm:$0xff] }
 0x524   :  { %733 = vmatpush.msra.mxu0 %v707_v40 }
 0x525   :  { %v539_v44 = vsub.f32 %v1949_v32, %v537_v43 }
 0x527   :  { %v541_v51 = vmul.f32 %v539_v44, %v539_v44 }
 0x529   :  { %v543_v5 = vsel %vm72_vm1, %v541_v51, 0.0  ;;  %v706_v51 = vld [vmem:[%s2364_s1 + $0x88] sm:$0xff] }
 0x52a   :  { %544 = vadd.xlane.f32.xlu0 %v543_v5  ;;  %734 = vmatpush.msra.mxu0 %v706_v51 }
 0x533   :  { %v536_v58 = vpop.xlane.xlu2 %535 }
 0x534   :  { %v538_v33 = vmul.f32 %v536_v58, %v1795_v31 }
 0x536   :  { %v540_v38 = vsub.f32 %v1954_v37, %v538_v33 }
 0x538   :  { %v542_v7 = vmul.f32 %v540_v38, %v540_v38 }
 0x53a   :  { %v546_v45 = vsel %vm72_vm1, %v542_v7, 0.0 }
 0x53b   :  { %547 = vadd.xlane.f32.xlu1 %v546_v45 }
 0x59d   :  { %v545_v52 = vpop.xlane.xlu0 %544 }
 0x59e   :  { %v549_v34 = vmul.f32 %v545_v52, %v1795_v31 }
 0x5a0   :  { %v551_v53 = vadd.f32 1e-05, %v549_v34 }
 0x5a2   :  { %1685 = vrsqrt.f32 %v551_v53  ;;  %vm559_vm0 = vweird.f32 %v551_v53 }
 0x5a8   :  { %v1686_v54 = vpop.eup %1685 }
 0x5a9   :  { %v554_v55 = vmul.f32 %v1686_v54, %v551_v53  ;;  %vm560_vm15 = vweird.f32 %v1686_v54 }
 0x5aa   :  { %vm561_vm2 = vmor %vm559_vm0, %vm560_vm15 }
 0x5ab   :  { %v555_v56 = vmul.f32 %v1686_v54, %v554_v55 }
 0x5ad   :  { %v556_v57 = vmul.f32 0.5, %v555_v56 }
 0x5ae   :  { %v548_v59 = vpop.xlane.xlu1 %547 }
 0x5af   :  { %v550_v60 = vmul.f32 %v548_v59, %v1795_v31  ;;  %v557_v61 = vsub.f32 1.5, %v556_v57 }
 0x5b1   :  { %v552_v62 = vadd.f32 1e-05, %v550_v60  ;;  %v558_v63 = vmul.f32 %v1686_v54, %v557_v61 }
 0x5b3   :  { %1687 = vrsqrt.f32 %v552_v62  ;;  %v562_v1 = vsel %vm561_vm2, %v1686_v54, %v558_v63  ;;  %vm569_vm4 = vweird.f32 %v552_v62 }
 0x5b4   :  { %v573_v2 = vmul.f32 %v562_v1, %v539_v44 }
 0x5b6   :  { %v576_v4 = vmul.f32 %v1644_v0, %v573_v2 }
 0x5b8   :  { %v579_v8 = vadd.f32 %v1645_v3, %v576_v4 }
 0x5b9   :  { %v1688_v6 = vpop.eup %1687 }
 0x5ba   :  { %v564_v9 = vmul.f32 %v1688_v6, %v552_v62  ;;  %1606 = vmatmul.msk.f32.vlgmr.msrb.gmra.mxu3 %vm72_vm1, %v579_v8  ;;  %vm570_vm3 = vweird.f32 %v1688_v6 }
 0x5bb   :  { %vm571_vm5 = vmor %vm569_vm4, %vm570_vm3 }
 0x5bc   :  { %v565_v10 = vmul.f32 %v1688_v6, %v564_v9 }
 0x5be   :  { %v566_v41 = vmul.f32 0.5, %v565_v10 }
 0x5c0   :  { %v567_v11 = vsub.f32 1.5, %v566_v41 }
 0x5c2   :  { %v568_v12 = vmul.f32 %v1688_v6, %v567_v11 }
 0x5c4   :  { %v572_v13 = vsel %vm571_vm5, %v1688_v6, %v568_v12 }
 0x5c5   :  { %v574_v14 = vmul.f32 %v572_v13, %v540_v38  ;;  %v705_v38 = vld [vmem:[%s2364_s1 + $0x80] sm:$0xff] }
 0x5c6   :  { %735 = vmatpush.msra.mxu0 %v705_v38 }
 0x5c7   :  { %v577_v15 = vmul.f32 %v1644_v0, %v574_v14 }
 0x5c8   :  { %736 = vmatpush.msra.mxu0 %v704_v46 }
 0x5c9   :  { %v580_v16 = vadd.f32 %v1645_v3, %v577_v15 }
 0x5cb   :  { %1607 = vmatmul.msk.f32.gmra.mxu3 %vm72_vm1, %v580_v16 }
 0x63d   :  { %v610_v18 = vpop.f32.mrf.mxu3 }
 0x63e   :  { %v1989_v19 = vadd.f32 %v1646_v17, %v610_v18 }
 0x640   :  { %v1992_v20 = vmul.f32 0.70710677, %v1989_v19 }
 0x642   :  { %v620_v21 = vmul.f32 %v1992_v20, %v1992_v20 }
 0x644   :  { %v621_v22 = vmin.f32 %v620_v21, 16.0 }
 0x646   :  { %v622_v24 = vmul.f32 2.1237322e-06, %v621_v22  ;;  %v633_v25 = vmul.f32 3.8918573e-05, %v621_v22 }
 0x648   :  { %v623_v50 = vadd.f32 0.00028619796, %v622_v24  ;;  %v634_v27 = vadd.f32 0.001143296, %v633_v25 }
 0x64a   :  { %v624_v28 = vmul.f32 %v623_v50, %v621_v22  ;;  %v635_v29 = vmul.f32 %v634_v27, %v621_v22  ;;  %v616_v27 = vmul.f32 0.5, %v1989_v19 }
 0x64c   :  { %v625_v35 = vadd.f32 0.0036580483, %v624_v28  ;;  %v636_v36 = vadd.f32 0.014752088, %v635_v29 }
 0x64e   :  { %v613_v39 = vpop.f32.mrf.mxu3  ;;  %v637_v43 = vmul.f32 %v636_v36, %v621_v22  ;;  %v626_v5 = vmul.f32 %v625_v35, %v621_v22 }
 0x64f   :  { %v2011_v44 = vadd.f32 %v1646_v17, %v613_v39 }
 0x650   :  { %v638_v58 = vadd.f32 0.112945676, %v637_v43  ;;  %v627_v47 = vadd.f32 0.05243302, %v626_v5 }
 0x651   :  { %v2017_v33 = vmul.f32 0.70710677, %v2011_v44  ;;  %v617_v46 = vmul.f32 0.5, %v2011_v44 }
 0x652   :  { %v639_v7 = vmul.f32 %v638_v58, %v621_v22  ;;  %v628_v54 = vmul.f32 %v627_v47, %v621_v22 }
 0x653   :  { %v660_v45 = vmul.f32 %v2017_v33, %v2017_v33 }
 0x654   :  { %v640_v48 = vadd.f32 0.4994258, %v639_v7  ;;  %v629_v61 = vadd.f32 0.18741608, %v628_v54 }
 0x655   :  { %v661_v49 = vmin.f32 %v660_v45, 16.0 }
 0x656   :  { %v641_v52 = vmul.f32 %v640_v48, %v621_v22  ;;  %v630_v2 = vmul.f32 %v629_v61, %v621_v22 }
 0x657   :  { %v662_v34 = vmul.f32 2.1237322e-06, %v661_v49  ;;  %v673_v53 = vmul.f32 3.8918573e-05, %v661_v49 }
 0x658   :  { %v642_v55 = vadd.f32 1.0, %v641_v52  ;;  %v631_v10 = vadd.f32 1.1283791, %v630_v2  ;;  %v754_v2 = vld [vmem:[%s2366_s3 + $0x30] sm:$0xff] }
 0x659   :  { %v663_v56 = vadd.f32 0.00028619796, %v662_v34  ;;  %v674_v57 = vadd.f32 0.001143296, %v673_v53  ;;  %826 = vmatpush.msra.mxu1 %v754_v2 }
 0x65a   :  { %1689 = vrcp.f32 %v642_v55  ;;  %v654_v41 = vand.u32 2147483648, %v642_v55  ;;  %v652_v12 = vand.u32 2147483647, %v642_v55  ;;  %vm648_vm7 = vweird.f32 %v642_v55 }
 0x65b   :  { %v664_v59 = vmul.f32 %v663_v56, %v661_v49  ;;  %v675_v60 = vmul.f32 %v674_v57, %v661_v49  ;;  %v632_v18 = vmul.f32 %v631_v10, %v1992_v20  ;;  %v748_v10 = vld [vmem:[%s2366_s3] sm:$0xff] }
 0x65c   :  { %v655_v17 = vor.u32 1.1754944e-38, %v654_v41  ;;  %vm653_vm9 = vcmp.eq.f32.partialorder %v652_v12, 8.507059e+37  ;;  %v749_v41 = vld [vmem:[%s2366_s3 + $0x8] sm:$0xff] }
 0x65d   :  { %v676_v62 = vadd.f32 0.014752088, %v675_v60  ;;  %v665_v63 = vadd.f32 0.0036580483, %v664_v59 }
 0x65f   :  { %v677_v0 = vmul.f32 %v676_v62, %v661_v49  ;;  %v666_v6 = vmul.f32 %v665_v63, %v661_v49 }
 0x660   :  { %v1690_v1 = vpop.eup %1689 }
 0x661   :  { %v644_v3 = vmul.f32 %v1690_v1, %v642_v55  ;;  %v678_v4 = vadd.f32 0.112945676, %v677_v0  ;;  %vm649_vm6 = vweird.f32 %v1690_v1  ;;  %v667_v14 = vadd.f32 0.05243302, %v666_v6  ;;  %v2067_v6 = vld [vmem:[%s2366_s3 + $0x28] sm:$0xff] }
 0x662   :  { %vm650_vm8 = vmor %vm648_vm7, %vm649_vm6 }
 0x663   :  { %v645_v8 = vsub.f32 1.0, %v644_v3  ;;  %v679_v9 = vmul.f32 %v678_v4, %v661_v49  ;;  %v668_v24 = vmul.f32 %v667_v14, %v661_v49  ;;  %v2058_v3 = vld [vmem:[%s2366_s3 + $0x38] sm:$0xff]  ;;  %v752_v4 = vld [vmem:[%s2366_s3 + $0x20] sm:$0xff] }
 0x664   :  { %849 = vmatpush.msra.mxu2 %v2058_v3  ;;  %827 = vmatpush.msra.mxu1 %v752_v4 }
 0x665   :  { %v646_v11 = vmul.f32 %v1690_v1, %v645_v8  ;;  %v680_v13 = vadd.f32 0.4994258, %v679_v9  ;;  %v669_v50 = vadd.f32 0.18741608, %v668_v24  ;;  %v750_v8 = vld [vmem:[%s2366_s3 + $0x10] sm:$0xff]  ;;  %v2076_v9 = vld [vmem:[%s2366_s3 + $0x18] sm:$0xff] }
 0x666   :  { %850 = vmatpush.msra.mxu2 %v2067_v6  ;;  %828 = vmatpush.msra.mxu1 %v750_v8 }
 0x667   :  { %v647_v15 = vadd.f32 %v1690_v1, %v646_v11  ;;  %v681_v16 = vmul.f32 %v680_v13, %v661_v49  ;;  %v670_v30 = vmul.f32 %v669_v50, %v661_v49  ;;  %v1647_v49 = vld [vmem:[%s2364_s1 + $0x16e] ss:$0 sm:$0xff] }
 0x668   :  { %851 = vmatpush.msra.mxu2 %v2076_v9  ;;  %829 = vmatpush.msra.mxu1 %v748_v10 }
 0x669   :  { %v651_v21 = vsel %vm650_vm8, %v1690_v1, %v647_v15  ;;  %v682_v22 = vadd.f32 1.0, %v681_v16  ;;  %v671_v39 = vadd.f32 1.1283791, %v670_v30 }
 0x66a   :  { %v656_v23 = vsel %vm653_vm9, %v655_v17, %v651_v21  ;;  %852 = vmatpush.msra.mxu2 %v749_v41 }
 0x66b   :  { %v657_v25 = vmul.f32 %v656_v23, %v632_v18  ;;  %1691 = vrcp.f32 %v682_v22  ;;  %v694_v36 = vand.u32 2147483648, %v682_v22  ;;  %v692_v43 = vand.u32 2147483647, %v682_v22 }
 0x66c   :  { %vm688_vm12 = vweird.f32 %v682_v22  ;;  %v672_v19 = vmul.f32 %v671_v39, %v2017_v33  ;;  %1175 = vmatpush.msrb.mxu2 %v754_v2 }
 0x66d   :  { %v1608_v26 = vclamps-f32 %v657_v25, 1.0  ;;  %v695_v5 = vor.u32 1.1754944e-38, %v694_v36  ;;  %vm693_vm14 = vcmp.eq.f32.partialorder %v692_v43, 8.507059e+37  ;;  %v1648_v25 = vld [vmem:[%s2364_s1 + $0x172] ss:$0 sm:$0xff] }
 0x66e   :  { %1176 = vmatpush.msrb.mxu2 %v752_v4 }
 0x66f   :  { %v700_v42 = vadd.f32 1.0, %v1608_v26 }
 0x670   :  { %1177 = vmatpush.msrb.mxu2 %v750_v8 }
 0x671   :  { %v1692_v28 = vpop.eup %1691  ;;  %v702_v29 = vmul.f32 %v700_v42, %v616_v27  ;;  %v1649_v27 = vld [vmem:[%s2364_s1 + $0x173] ss:$0 sm:$0xff] }
 0x672   :  { %v684_v35 = vmul.f32 %v1692_v28, %v682_v22  ;;  %vm689_vm11 = vweird.f32 %v1692_v28  ;;  %1178 = vmatpush.msrb.mxu2 %v748_v10 }
 0x673   :  { %1610 = vmatmul.msk.f32.vlgmr.msra.gmra.mxu0 %vm714_vm10, %v702_v29  ;;  %vm690_vm13 = vmor %vm688_vm12, %vm689_vm11 }
 0x674   :  { %v685_v20 = vsub.f32 1.0, %v684_v35 }
 0x676   :  { %v686_v40 = vmul.f32 %v1692_v28, %v685_v20 }
 0x678   :  { %v687_v51 = vadd.f32 %v1692_v28, %v686_v40 }
 0x67a   :  { %v691_v58 = vsel %vm690_vm13, %v1692_v28, %v687_v51 }
 0x67b   :  { %v696_v38 = vsel %vm693_vm14, %v695_v5, %v691_v58 }
 0x67c   :  { %v697_v7 = vmul.f32 %v696_v38, %v672_v19 }
 0x67e   :  { %v1609_v45 = vclamps-f32 %v697_v7, 1.0 }
 0x680   :  { %v701_v47 = vadd.f32 1.0, %v1609_v45  ;;  %v2100_v45 = vld [vmem:[%s2364_s1 + $0xb8] sm:$0xff] }
 0x682   :  { %v703_v48 = vmul.f32 %v701_v47, %v617_v46  ;;  %v2109_v46 = vld [vmem:[%s2364_s1 + $0xc0] sm:$0xff] }
 0x684   :  { %1611 = vmatmul.msk.f32.gmra.mxu0 %vm714_vm10, %v703_v48 }
 0x6f0   :  { %v738_v52 = vpop.f32.mrf.mxu0 }
 0x6f1   :  { %v739_v34 = vadd.f32 %v1647_v49, %v738_v52 }
 0x6f3   :  { %v2037_v53 = vadd.f32 %v739_v34, %v1949_v32 }
 0x6f5   :  { %v758_v33 = vsel %vm72_vm1, %v2037_v53, 0.0 }
 0x6f6   :  { %759 = vadd.xlane.f32.xlu2 %v758_v33 }
 0x701   :  { %v741_v54 = vpop.f32.mrf.mxu0 }
 0x702   :  { %v742_v55 = vadd.f32 %v1647_v49, %v741_v54 }
 0x704   :  { %v2042_v44 = vadd.f32 %v742_v55, %v1954_v37 }
 0x706   :  { %v761_v56 = vsel %vm72_vm1, %v2042_v44, 0.0 }
 0x707   :  { %762 = vadd.xlane.f32.xlu0 %v761_v56 }
 0x769   :  { %v760_v57 = vpop.xlane.xlu2 %759 }
 0x76a   :  { %v764_v59 = vmul.f32 %v760_v57, %v1795_v31 }
 0x76c   :  { %v766_v60 = vsub.f32 %v2037_v53, %v764_v59 }
 0x76e   :  { %v768_v32 = vmul.f32 %v766_v60, %v766_v60 }
 0x770   :  { %v770_v61 = vsel %vm72_vm1, %v768_v32, 0.0 }
 0x771   :  { %771 = vadd.xlane.f32.xlu1 %v770_v61 }
 0x77a   :  { %v763_v62 = vpop.xlane.xlu0 %762 }
 0x77b   :  { %v765_v63 = vmul.f32 %v763_v62, %v1795_v31  ;;  %v944_v62 = vld [vmem:[%s2367_s2 + $0x38] sm:$0xff] }
 0x77c   :  { %965 = vmatpush.msrb.mxu1 %v944_v62  ;;  %v1066_v62 = vld [vmem:[%s2364_s1 + $0xd8] sm:$0xff] }
 0x77d   :  { %v767_v0 = vsub.f32 %v2042_v44, %v765_v63  ;;  %v943_v63 = vld [vmem:[%s2367_s2 + $0x30] sm:$0xff] }
 0x77e   :  { %966 = vmatpush.msrb.mxu1 %v943_v63 }
 0x77f   :  { %v769_v37 = vmul.f32 %v767_v0, %v767_v0 }
 0x781   :  { %v773_v1 = vsel %vm72_vm1, %v769_v37, 0.0  ;;  %v941_v37 = vld [vmem:[%s2367_s2 + $0x20] sm:$0xff] }
 0x782   :  { %774 = vadd.xlane.f32.xlu2 %v773_v1 }
 0x7e4   :  { %v772_v11 = vpop.xlane.xlu1 %771 }
 0x7e5   :  { %v776_v12 = vmul.f32 %v772_v11, %v1795_v31 }
 0x7e7   :  { %v778_v13 = vadd.f32 1e-05, %v776_v12 }
 0x7e9   :  { %1693 = vrsqrt.f32 %v778_v13  ;;  %vm786_vm0 = vweird.f32 %v778_v13 }
 0x7ef   :  { %v1694_v14 = vpop.eup %1693 }
 0x7f0   :  { %v781_v15 = vmul.f32 %v1694_v14, %v778_v13  ;;  %vm787_vm15 = vweird.f32 %v1694_v14 }
 0x7f1   :  { %vm788_vm2 = vmor %vm786_vm0, %vm787_vm15 }
 0x7f2   :  { %v782_v16 = vmul.f32 %v1694_v14, %v781_v15 }
 0x7f4   :  { %v783_v17 = vmul.f32 0.5, %v782_v16  ;;  %v1650_v16 = vld [vmem:[%s2364_s1 + $0x174] ss:$0 sm:$0xff] }
 0x7f5   :  { %v775_v18 = vpop.xlane.xlu2 %774 }
 0x7f6   :  { %v784_v21 = vsub.f32 1.5, %v783_v17  ;;  %v777_v22 = vmul.f32 %v775_v18, %v1795_v31 }
 0x7f8   :  { %v785_v23 = vmul.f32 %v1694_v14, %v784_v21  ;;  %v779_v24 = vadd.f32 1e-05, %v777_v22  ;;  %v1651_v22 = vld [vmem:[%s2364_s1 + $0x175] ss:$0 sm:$0xff] }
 0x7fa   :  { %v789_v26 = vsel %vm788_vm2, %v1694_v14, %v785_v23  ;;  %1695 = vrsqrt.f32 %v779_v24  ;;  %vm796_vm4 = vweird.f32 %v779_v24 }
 0x7fb   :  { %v800_v50 = vmul.f32 %v789_v26, %v766_v60 }
 0x7fd   :  { %v803_v42 = vmul.f32 %v1648_v25, %v800_v50 }
 0x7ff   :  { %v806_v28 = vadd.f32 %v1649_v27, %v803_v42 }
 0x800   :  { %v1696_v29 = vpop.eup %1695 }
 0x801   :  { %v791_v30 = vmul.f32 %v1696_v29, %v779_v24  ;;  %1612 = vmatmul.msk.f32.vlgmr.msra.gmra.mxu1 %vm72_vm1, %v806_v28  ;;  %1614 = vmatmul.msk.f32.vlgmr.msra.gmra.mxu2 %vm72_vm1, %v806_v28  ;;  %vm797_vm3 = vweird.f32 %v1696_v29 }
 0x802   :  { %vm798_vm5 = vmor %vm796_vm4, %vm797_vm3 }
 0x803   :  { %v792_v35 = vmul.f32 %v1696_v29, %v791_v30  ;;  %v1652_v30 = vld [vmem:[%s2367_s2 + $0x61] ss:$0 sm:$0xff] }
 0x805   :  { %v793_v20 = vmul.f32 0.5, %v792_v35 }
 0x807   :  { %v794_v36 = vsub.f32 1.5, %v793_v20 }
 0x809   :  { %v795_v39 = vmul.f32 %v1696_v29, %v794_v36 }
 0x80b   :  { %v799_v40 = vsel %vm798_vm5, %v1696_v29, %v795_v39 }
 0x80c   :  { %v801_v43 = vmul.f32 %v799_v40, %v767_v0  ;;  %v942_v0 = vld [vmem:[%s2367_s2 + $0x28] sm:$0xff] }
 0x80d   :  { %967 = vmatpush.msrb.mxu1 %v942_v0 }
 0x80e   :  { %v804_v51 = vmul.f32 %v1648_v25, %v801_v43 }
 0x80f   :  { %968 = vmatpush.msrb.mxu1 %v941_v37 }
 0x810   :  { %v807_v5 = vadd.f32 %v1649_v27, %v804_v51  ;;  %v1071_v51 = vld [vmem:[%s2364_s1 + $0x100] sm:$0xff] }
 0x811   :  { %1088 = vmatpush.msrb.mxu0 %v1071_v51 }
 0x812   :  { %1613 = vmatmul.msk.f32.gmra.mxu1 %vm72_vm1, %v807_v5  ;;  %1615 = vmatmul.msk.f32.gmra.mxu2 %vm72_vm1, %v807_v5 }
 0x87e   :  { %v831_v58 = vpop.f32.mrf.mxu1 }
 0x884   :  { %v854_v19 = vpop.f32.mrf.mxu2 }
 0x88f   :  { %v834_v7 = vpop.f32.mrf.mxu1 }
 0x895   :  { %v857_v38 = vpop.f32.mrf.mxu2 }
 0x896   :  { %878 = vmatpush.msra.mxu3 %v857_v38  ;;  %v1070_v38 = vld [vmem:[%s2364_s1 + $0xf8] sm:$0xff] }
 0x897   :  { %1089 = vmatpush.msrb.mxu0 %v1070_v38 }
 0x898   :  { %879 = vmatpush.msra.mxu3 %v854_v19 }
 0x89a   :  { %880 = vmatpush.msra.mxu3 %v834_v7 }
 0x89c   :  { %881 = vmatpush.msra.mxu3 %v831_v58 }
 0x89d   :  { %1616 = vmatmul.msk.f32.vlgmr.msra.gmra.mxu3 %vm72_vm1, %v2100_v45 }
 0x89e   :  { %1198 = vmatpush.msrb.mxu3 %v2058_v3 }
 0x8a0   :  { %1199 = vmatpush.msrb.mxu3 %v2067_v6 }
 0x8a2   :  { %1200 = vmatpush.msrb.mxu3 %v2076_v9 }
 0x8a4   :  { %1201 = vmatpush.msrb.mxu3 %v749_v41 }
 0x8a5   :  { %1617 = vmatmul.msk.f32.gmra.mxu3 %vm72_vm1, %v2109_v46 }
 0x920   :  { %v883_v47 = vpop.f32.mrf.mxu3 }
 0x921   :  { %v2115_v48 = vadd.f32 %v883_v47, %v2037_v53 }
 0x923   :  { %v891_v49 = vsel %vm72_vm1, %v2115_v48, 0.0 }
 0x924   :  { %892 = vadd.xlane.f32.xlu0 %v891_v49 }
 0x928   :  { %v886_v52 = vpop.f32.mrf.mxu3 }
 0x929   :  { %v2120_v34 = vadd.f32 %v886_v52, %v2042_v44  ;;  %v1069_v52 = vld [vmem:[%s2364_s1 + $0xf0] sm:$0xff] }
 0x92a   :  { %1090 = vmatpush.msrb.mxu0 %v1069_v52 }
 0x92b   :  { %v894_v33 = vsel %vm72_vm1, %v2120_v34, 0.0 }
 0x92c   :  { %895 = vadd.xlane.f32.xlu1 %v894_v33 }
 0x997   :  { %v893_v54 = vpop.xlane.xlu0 %892 }
 0x998   :  { %v897_v55 = vmul.f32 %v893_v54, %v1795_v31 }
 0x99a   :  { %v899_v56 = vsub.f32 %v2115_v48, %v897_v55 }
 0x99c   :  { %v901_v57 = vmul.f32 %v899_v56, %v899_v56 }
 0x99e   :  { %v903_v53 = vsel %vm72_vm1, %v901_v57, 0.0 }
 0x99f   :  { %v896_v59 = vpop.xlane.xlu1 %895  ;;  %904 = vadd.xlane.f32.xlu2 %v903_v53 }
 0x9a0   :  { %v898_v60 = vmul.f32 %v896_v59, %v1795_v31 }
 0x9a2   :  { %v900_v32 = vsub.f32 %v2120_v34, %v898_v60  ;;  %v1067_v60 = vld [vmem:[%s2364_s1 + $0xe0] sm:$0xff] }
 0x9a4   :  { %v902_v44 = vmul.f32 %v900_v32, %v900_v32 }
 0x9a6   :  { %v906_v61 = vsel %vm72_vm1, %v902_v44, 0.0 }
 0x9a7   :  { %907 = vadd.xlane.f32.xlu0 %v906_v61 }
 0xa12   :  { %v905_v1 = vpop.xlane.xlu2 %904 }
 0xa13   :  { %v909_v2 = vmul.f32 %v905_v1, %v1795_v31 }
 0xa15   :  { %v911_v3 = vadd.f32 1e-05, %v909_v2  ;;  %v1065_v2 = vld [vmem:[%s2364_s1 + $0xd0] sm:$0xff] }
 0xa17   :  { %1697 = vrsqrt.f32 %v911_v3  ;;  %vm919_vm7 = vweird.f32 %v911_v3 }
 0xa1a   :  { %v908_v4 = vpop.xlane.xlu0 %907 }
 0xa1b   :  { %v910_v6 = vmul.f32 %v908_v4, %v1795_v31 }
 0xa1d   :  { %v1698_v8 = vpop.eup %1697  ;;  %v912_v9 = vadd.f32 1e-05, %v910_v6 }
 0xa1e   :  { %v914_v10 = vmul.f32 %v1698_v8, %v911_v3  ;;  %vm920_vm6 = vweird.f32 %v1698_v8 }
 0xa1f   :  { %1699 = vrsqrt.f32 %v912_v9  ;;  %vm921_vm8 = vmor %vm919_vm7, %vm920_vm6  ;;  %vm929_vm11 = vweird.f32 %v912_v9 }
 0xa20   :  { %v915_v41 = vmul.f32 %v1698_v8, %v914_v10 }
 0xa22   :  { %v916_v11 = vmul.f32 0.5, %v915_v41 }
 0xa24   :  { %v917_v12 = vsub.f32 1.5, %v916_v11 }
 0xa25   :  { %v1700_v13 = vpop.eup %1699 }
 0xa26   :  { %v918_v14 = vmul.f32 %v1698_v8, %v917_v12  ;;  %v924_v15 = vmul.f32 %v1700_v13, %v912_v9  ;;  %vm930_vm9 = vweird.f32 %v1700_v13 }
 0xa27   :  { %vm931_vm12 = vmor %vm929_vm11, %vm930_vm9 }
 0xa28   :  { %v922_v17 = vsel %vm921_vm8, %v1698_v8, %v918_v14  ;;  %v925_v18 = vmul.f32 %v1700_v13, %v924_v15  ;;  %v1064_v8 = vld [vmem:[%s2364_s1 + $0xc8] sm:$0xff] }
 0xa29   :  { %v933_v21 = vmul.f32 %v922_v17, %v899_v56  ;;  %v1068_v56 = vld [vmem:[%s2364_s1 + $0xe8] sm:$0xff] }
 0xa2a   :  { %v926_v23 = vmul.f32 0.5, %v925_v18  ;;  %1091 = vmatpush.msrb.mxu0 %v1068_v56 }
 0xa2b   :  { %v936_v24 = vmul.f32 %v1650_v16, %v933_v21 }
 0xa2c   :  { %v927_v25 = vsub.f32 1.5, %v926_v23  ;;  %1092 = vmatpush.msrb.mxu0 %v1067_v60 }
 0xa2d   :  { %v939_v26 = vadd.f32 %v1651_v22, %v936_v24 }
 0xa2e   :  { %v928_v50 = vmul.f32 %v1700_v13, %v927_v25  ;;  %1093 = vmatpush.msrb.mxu0 %v1066_v62 }
 0xa2f   :  { %1618 = vmatmul.msk.f32.vlgmr.msrb.gmra.mxu1 %vm72_vm1, %v939_v26 }
 0xa30   :  { %v932_v27 = vsel %vm931_vm12, %v1700_v13, %v928_v50  ;;  %1094 = vmatpush.msrb.mxu0 %v1065_v2 }
 0xa31   :  { %v934_v42 = vmul.f32 %v932_v27, %v900_v32 }
 0xa32   :  { %1095 = vmatpush.msrb.mxu0 %v1064_v8 }
 0xa33   :  { %v937_v28 = vmul.f32 %v1650_v16, %v934_v42 }
 0xa35   :  { %v940_v29 = vadd.f32 %v1651_v22, %v937_v28 }
 0xa37   :  { %1619 = vmatmul.msk.f32.gmra.mxu1 %vm72_vm1, %v940_v29 }
 0xaac   :  { %v970_v35 = vpop.f32.mrf.mxu1 }
 0xaad   :  { %v2155_v20 = vadd.f32 %v1652_v30, %v970_v35 }
 0xaaf   :  { %v2158_v36 = vmul.f32 0.70710677, %v2155_v20 }
 0xab1   :  { %v980_v39 = vmul.f32 %v2158_v36, %v2158_v36 }
 0xab3   :  { %v981_v40 = vmin.f32 %v980_v39, 16.0 }
 0xab4   :  { %v973_v43 = vpop.f32.mrf.mxu1 }
 0xab5   :  { %v982_v5 = vmul.f32 2.1237322e-06, %v981_v40  ;;  %v993_v19 = vmul.f32 3.8918573e-05, %v981_v40  ;;  %v2165_v58 = vadd.f32 %v1652_v30, %v973_v43 }
 0xab7   :  { %v983_v7 = vadd.f32 0.00028619796, %v982_v5  ;;  %v994_v47 = vadd.f32 0.001143296, %v993_v19  ;;  %v2171_v49 = vmul.f32 0.70710677, %v2165_v58 }
 0xab8   :  { %v977_v2 = vmul.f32 0.5, %v2165_v58 }
 0xab9   :  { %v984_v33 = vmul.f32 %v983_v7, %v981_v40  ;;  %v995_v54 = vmul.f32 %v994_v47, %v981_v40  ;;  %v1020_v55 = vmul.f32 %v2171_v49, %v2171_v49 }
 0xabb   :  { %v996_v57 = vadd.f32 0.014752088, %v995_v54  ;;  %v985_v53 = vadd.f32 0.0036580483, %v984_v33  ;;  %v1021_v59 = vmin.f32 %v1020_v55, 16.0 }
 0xabd   :  { %v997_v32 = vmul.f32 %v996_v57, %v981_v40  ;;  %v1022_v44 = vmul.f32 2.1237322e-06, %v1021_v59  ;;  %v1033_v61 = vmul.f32 3.8918573e-05, %v1021_v59  ;;  %v986_v0 = vmul.f32 %v985_v53, %v981_v40 }
 0xabf   :  { %v998_v63 = vadd.f32 0.112945676, %v997_v32  ;;  %v1023_v37 = vadd.f32 0.00028619796, %v1022_v44  ;;  %v1034_v1 = vadd.f32 0.001143296, %v1033_v61 }
 0xac0   :  { %v987_v10 = vadd.f32 0.05243302, %v986_v0  ;;  %v976_v32 = vmul.f32 0.5, %v2155_v20  ;;  %v1653_v20 = vld [vmem:[%s2364_s1 + $0x176] ss:$0 sm:$0xff] }
 0xac1   :  { %v999_v3 = vmul.f32 %v998_v63, %v981_v40  ;;  %v1024_v4 = vmul.f32 %v1023_v37, %v1021_v59  ;;  %v1035_v6 = vmul.f32 %v1034_v1, %v1021_v59 }
 0xac2   :  { %v988_v15 = vmul.f32 %v987_v10, %v981_v40 }
 0xac3   :  { %v1000_v9 = vadd.f32 0.4994258, %v999_v3  ;;  %v1036_v41 = vadd.f32 0.014752088, %v1035_v6  ;;  %v1025_v12 = vadd.f32 0.0036580483, %v1024_v4 }
 0xac4   :  { %v989_v21 = vadd.f32 0.18741608, %v988_v15 }
 0xac5   :  { %v1001_v11 = vmul.f32 %v1000_v9, %v981_v40  ;;  %v1037_v13 = vmul.f32 %v1036_v41, %v1021_v59  ;;  %v1026_v17 = vmul.f32 %v1025_v12, %v1021_v59 }
 0xac6   :  { %v990_v26 = vmul.f32 %v989_v21, %v981_v40 }
 0xac7   :  { %v1002_v14 = vadd.f32 1.0, %v1001_v11  ;;  %v1038_v16 = vadd.f32 0.112945676, %v1037_v13  ;;  %v1027_v23 = vadd.f32 0.05243302, %v1026_v17 }
 0xac8   :  { %v991_v30 = vadd.f32 1.1283791, %v990_v26 }
 0xac9   :  { %1701 = vrcp.f32 %v1002_v14  ;;  %v1039_v18 = vmul.f32 %v1038_v16, %v1021_v59  ;;  %v1028_v42 = vmul.f32 %v1027_v23, %v1021_v59  ;;  %v1014_v29 = vand.u32 2147483648, %v1002_v14 }
 0xaca   :  { %v1012_v39 = vand.u32 2147483647, %v1002_v14  ;;  %vm1008_vm14 = vweird.f32 %v1002_v14  ;;  %v992_v38 = vmul.f32 %v991_v30, %v2158_v36 }
 0xacb   :  { %v1040_v22 = vadd.f32 0.4994258, %v1039_v18  ;;  %v1029_v43 = vadd.f32 0.18741608, %v1028_v42  ;;  %v1015_v5 = vor.u32 1.1754944e-38, %v1014_v29 }
 0xacc   :  { %vm1013_vm0 = vcmp.eq.f32.partialorder %v1012_v39, 8.507059e+37 }
 0xacd   :  { %v1041_v24 = vmul.f32 %v1040_v22, %v1021_v59  ;;  %v1030_v47 = vmul.f32 %v1029_v43, %v1021_v59  ;;  %v1654_v43 = vld [vmem:[%s2364_s1 + $0x177] ss:$0 sm:$0xff] }
 0xacf   :  { %v1702_v25 = vpop.eup %1701  ;;  %v1042_v27 = vadd.f32 1.0, %v1041_v24  ;;  %v1031_v57 = vadd.f32 1.1283791, %v1030_v47 }
 0xad0   :  { %v1004_v50 = vmul.f32 %v1702_v25, %v1002_v14  ;;  %vm1009_vm13 = vweird.f32 %v1702_v25 }
 0xad1   :  { %1703 = vrcp.f32 %v1042_v27  ;;  %vm1010_vm15 = vmor %vm1008_vm14, %vm1009_vm13  ;;  %v1054_v56 = vand.u32 2147483648, %v1042_v27  ;;  %v1052_v60 = vand.u32 2147483647, %v1042_v27  ;;  %vm1048_vm3 = vweird.f32 %v1042_v27 }
 0xad2   :  { %v1005_v28 = vsub.f32 1.0, %v1004_v50  ;;  %v1032_v63 = vmul.f32 %v1031_v57, %v2171_v49 }
 0xad3   :  { %v1055_v36 = vor.u32 1.1754944e-38, %v1054_v56  ;;  %vm1053_vm5 = vcmp.eq.f32.partialorder %v1052_v60, 8.507059e+37 }
 0xad4   :  { %v1006_v35 = vmul.f32 %v1702_v25, %v1005_v28 }
 0xad6   :  { %v1007_v51 = vadd.f32 %v1702_v25, %v1006_v35 }
 0xad7   :  { %v1704_v19 = vpop.eup %1703 }
 0xad8   :  { %v1011_v7 = vsel %vm1010_vm15, %v1702_v25, %v1007_v51  ;;  %v1044_v52 = vmul.f32 %v1704_v19, %v1042_v27  ;;  %vm1049_vm2 = vweird.f32 %v1704_v19 }
 0xad9   :  { %v1016_v40 = vsel %vm1013_vm0, %v1015_v5, %v1011_v7  ;;  %vm1050_vm4 = vmor %vm1048_vm3, %vm1049_vm2  ;;  %v1655_v7 = vld [vmem:[%s2364_s1 + $0x178] ss:$0 sm:$0xff] }
 0xada   :  { %v1017_v33 = vmul.f32 %v1016_v40, %v992_v38  ;;  %v1045_v54 = vsub.f32 1.0, %v1044_v52 }
 0xadc   :  { %v1620_v55 = vclamps-f32 %v1017_v33, 1.0  ;;  %v1046_v53 = vmul.f32 %v1704_v19, %v1045_v54 }
 0xade   :  { %v1060_v44 = vadd.f32 1.0, %v1620_v55  ;;  %v1047_v61 = vadd.f32 %v1704_v19, %v1046_v53 }
 0xae0   :  { %v1062_v62 = vmul.f32 %v1060_v44, %v976_v32  ;;  %v1051_v59 = vsel %vm1050_vm4, %v1704_v19, %v1047_v61 }
 0xae1   :  { %v1056_v0 = vsel %vm1053_vm5, %v1055_v36, %v1051_v59 }
 0xae2   :  { %1622 = vmatmul.msk.f32.vlgmr.msrb.gmra.mxu0 %vm714_vm10, %v1062_v62  ;;  %v1057_v37 = vmul.f32 %v1056_v0, %v1032_v63 }
 0xae4   :  { %v1621_v1 = vclamps-f32 %v1057_v37, 1.0 }
 0xae6   :  { %v1061_v3 = vadd.f32 1.0, %v1621_v1 }
 0xae8   :  { %v1063_v4 = vmul.f32 %v1061_v3, %v977_v2 }
 0xaea   :  { %1623 = vmatmul.msk.f32.gmra.mxu0 %vm714_vm10, %v1063_v4 }
 0xb5f   :  { %v1097_v6 = vpop.f32.mrf.mxu0 }
 0xb60   :  { %v1098_v8 = vadd.f32 %v1653_v20, %v1097_v6 }
 0xb62   :  { %v2203_v49 = vadd.f32 %v1098_v8, %v2115_v48 }
 0xb64   :  { %v1107_v9 = vsel %vm72_vm1, %v2203_v49, 0.0 }
 0xb65   :  { %1108 = vadd.xlane.f32.xlu1 %v1107_v9  ;;  %v1287_v9 = vld [vmem:[%s2367_s2 + $0x58] sm:$0xff] }
 0xb66   :  { %1308 = vmatpush.msra.mxu0 %v1287_v9 }
 0xb67   :  { %v1100_v10 = vpop.f32.mrf.mxu0 }
 0xb68   :  { %v1101_v41 = vadd.f32 %v1653_v20, %v1100_v10  ;;  %v1286_v10 = vld [vmem:[%s2367_s2 + $0x50] sm:$0xff] }
 0xb69   :  { %1309 = vmatpush.msra.mxu0 %v1286_v10 }
 0xb6a   :  { %v2208_v58 = vadd.f32 %v1101_v41, %v2120_v34  ;;  %v1285_v41 = vld [vmem:[%s2367_s2 + $0x48] sm:$0xff] }
 0xb6b   :  { %1310 = vmatpush.msra.mxu0 %v1285_v41 }
 0xb6c   :  { %v1110_v11 = vsel %vm72_vm1, %v2208_v58, 0.0 }
 0xb6d   :  { %1111 = vadd.xlane.f32.xlu2 %v1110_v11 }
 0xbd8   :  { %v1109_v12 = vpop.xlane.xlu1 %1108 }
 0xbd9   :  { %v1113_v13 = vmul.f32 %v1109_v12, %v1795_v31 }
 0xbdb   :  { %v1115_v14 = vsub.f32 %v2203_v49, %v1113_v13 }
 0xbdd   :  { %v1117_v48 = vmul.f32 %v1115_v14, %v1115_v14 }
 0xbdf   :  { %v1119_v15 = vsel %vm72_vm1, %v1117_v48, 0.0 }
 0xbe0   :  { %1120 = vadd.xlane.f32.xlu0 %v1119_v15  ;;  %v1112_v16 = vpop.xlane.xlu2 %1111 }
 0xbe1   :  { %v1114_v17 = vmul.f32 %v1112_v16, %v1795_v31 }
 0xbe3   :  { %v1116_v18 = vsub.f32 %v2208_v58, %v1114_v17 }
 0xbe5   :  { %v1118_v34 = vmul.f32 %v1116_v18, %v1116_v18 }
 0xbe7   :  { %v1122_v21 = vsel %vm72_vm1, %v1118_v34, 0.0 }
 0xbe8   :  { %1123 = vadd.xlane.f32.xlu1 %v1122_v21 }
 0xc53   :  { %v1121_v22 = vpop.xlane.xlu0 %1120 }
 0xc54   :  { %v1125_v23 = vmul.f32 %v1121_v22, %v1795_v31 }
 0xc56   :  { %v1127_v24 = vadd.f32 1e-05, %v1125_v23 }
 0xc58   :  { %1705 = vrsqrt.f32 %v1127_v24  ;;  %vm1135_vm7 = vweird.f32 %v1127_v24 }
 0xc5b   :  { %v1124_v25 = vpop.xlane.xlu1 %1123 }
 0xc5c   :  { %v1126_v26 = vmul.f32 %v1124_v25, %v1795_v31  ;;  %v1656_v25 = vld [vmem:[%s2364_s1 + $0x179] ss:$0 sm:$0xff] }
 0xc5e   :  { %v1706_v50 = vpop.eup %1705  ;;  %v1128_v42 = vadd.f32 1e-05, %v1126_v26 }
 0xc5f   :  { %v1130_v27 = vmul.f32 %v1706_v50, %v1127_v24  ;;  %vm1136_vm6 = vweird.f32 %v1706_v50 }
 0xc60   :  { %1707 = vrsqrt.f32 %v1128_v42  ;;  %vm1137_vm8 = vmor %vm1135_vm7, %vm1136_vm6  ;;  %vm1145_vm11 = vweird.f32 %v1128_v42 }
 0xc61   :  { %v1131_v28 = vmul.f32 %v1706_v50, %v1130_v27 }
 0xc63   :  { %v1132_v29 = vmul.f32 0.5, %v1131_v28 }
 0xc65   :  { %v1133_v30 = vsub.f32 1.5, %v1132_v29 }
 0xc66   :  { %v1708_v35 = vpop.eup %1707 }
 0xc67   :  { %v1134_v39 = vmul.f32 %v1706_v50, %v1133_v30  ;;  %v1140_v51 = vmul.f32 %v1708_v35, %v1128_v42  ;;  %vm1146_vm9 = vweird.f32 %v1708_v35  ;;  %v1657_v42 = vld [vmem:[%s2364_s1 + $0x17a] ss:$0 sm:$0xff] }
 0xc68   :  { %vm1147_vm12 = vmor %vm1145_vm11, %vm1146_vm9 }
 0xc69   :  { %v1138_v5 = vsel %vm1137_vm8, %v1706_v50, %v1134_v39  ;;  %v1141_v38 = vmul.f32 %v1708_v35, %v1140_v51 }
 0xc6a   :  { %v1149_v19 = vmul.f32 %v1138_v5, %v1115_v14 }
 0xc6b   :  { %v1142_v47 = vmul.f32 0.5, %v1141_v38  ;;  %v1658_v38 = vld [vmem:[%s2367_s2 + $0x62] ss:$0 sm:$0xff] }
 0xc6c   :  { %v1152_v40 = vmul.f32 %v1654_v43, %v1149_v19 }
 0xc6d   :  { %v1143_v52 = vsub.f32 1.5, %v1142_v47 }
 0xc6e   :  { %v1155_v33 = vadd.f32 %v1655_v7, %v1152_v40 }
 0xc6f   :  { %v1144_v54 = vmul.f32 %v1708_v35, %v1143_v52 }
 0xc70   :  { %1624 = vmatmul.msk.f32.vlgmr.msrb.gmra.mxu2 %vm72_vm1, %v1155_v33  ;;  %1626 = vmatmul.msk.f32.vlgmr.msrb.gmra.mxu3 %vm72_vm1, %v1155_v33 }
 0xc71   :  { %v1148_v55 = vsel %vm1147_vm12, %v1708_v35, %v1144_v54 }
 0xc72   :  { %v1150_v56 = vmul.f32 %v1148_v55, %v1116_v18  ;;  %v1414_v55 = vld [vmem:[%s2364_s1 + $0x140] sm:$0xff] }
 0xc73   :  { %1431 = vmatpush.msra.mxu2 %v1414_v55 }
 0xc74   :  { %v1153_v57 = vmul.f32 %v1654_v43, %v1150_v56 }
 0xc76   :  { %v1156_v53 = vadd.f32 %v1655_v7, %v1153_v57 }
 0xc78   :  { %1625 = vmatmul.msk.f32.gmra.mxu2 %vm72_vm1, %v1156_v53  ;;  %1627 = vmatmul.msk.f32.gmra.mxu3 %vm72_vm1, %v1156_v53 }
 0xcf3   :  { %v1203_v60 = vpop.f32.mrf.mxu3  ;;  %v1180_v32 = vpop.f32.mrf.mxu2 }
 0xcfb   :  { %v1206_v44 = vpop.f32.mrf.mxu3  ;;  %v1183_v61 = vpop.f32.mrf.mxu2 }
 0xcfc   :  { %1221 = vmatpush.msra.mxu1 %v1206_v44 }
 0xcfe   :  { %1222 = vmatpush.msra.mxu1 %v1203_v60  ;;  %v1413_v60 = vld [vmem:[%s2364_s1 + $0x138] sm:$0xff] }
 0xcff   :  { %1432 = vmatpush.msra.mxu2 %v1413_v60 }
 0xd00   :  { %1223 = vmatpush.msra.mxu1 %v1183_v61 }
 0xd02   :  { %1224 = vmatpush.msra.mxu1 %v1180_v32 }
 0xd03   :  { %1628 = vmatmul.msk.f32.vlgmr.msra.gmra.mxu1 %vm72_vm1, %v2100_v45 }
 0xd0b   :  { %1629 = vmatmul.msk.f32.gmra.mxu1 %vm72_vm1, %v2109_v46 }
 0xd80   :  { %v1226_v62 = vpop.f32.mrf.mxu1 }
 0xd81   :  { %v2235_v36 = vadd.f32 %v1226_v62, %v2203_v49  ;;  %v1412_v62 = vld [vmem:[%s2364_s1 + $0x130] sm:$0xff] }
 0xd82   :  { %1433 = vmatpush.msra.mxu2 %v1412_v62 }
 0xd83   :  { %v1234_v63 = vsel %vm72_vm1, %v2235_v36, 0.0 }
 0xd84   :  { %1235 = vadd.xlane.f32.xlu2 %v1234_v63 }
 0xd88   :  { %v1229_v59 = vpop.f32.mrf.mxu1 }
 0xd89   :  { %v2240_v0 = vadd.f32 %v1229_v59, %v2208_v58  ;;  %v1284_v58 = vld [vmem:[%s2367_s2 + $0x40] sm:$0xff] }
 0xd8a   :  { %1311 = vmatpush.msra.mxu0 %v1284_v58  ;;  %v1408_v58 = vld [vmem:[%s2364_s1 + $0x110] sm:$0xff] }
 0xd8b   :  { %v1237_v37 = vsel %vm72_vm1, %v2240_v0, 0.0 }
 0xd8c   :  { %1238 = vadd.xlane.f32.xlu0 %v1237_v37 }
 0xdf7   :  { %v1236_v45 = vpop.xlane.xlu2 %1235 }
 0xdf8   :  { %v1240_v1 = vmul.f32 %v1236_v45, %v1795_v31  ;;  %v1411_v45 = vld [vmem:[%s2364_s1 + $0x128] sm:$0xff] }
 0xdf9   :  { %1434 = vmatpush.msra.mxu2 %v1411_v45 }
 0xdfa   :  { %v1242_v46 = vsub.f32 %v2235_v36, %v1240_v1 }
 0xdfc   :  { %v1244_v2 = vmul.f32 %v1242_v46, %v1242_v46 }
 0xdfe   :  { %v1246_v3 = vsel %vm72_vm1, %v1244_v2, 0.0 }
 0xdff   :  { %v1239_v4 = vpop.xlane.xlu0 %1238  ;;  %1247 = vadd.xlane.f32.xlu1 %v1246_v3  ;;  %v1410_v3 = vld [vmem:[%s2364_s1 + $0x120] sm:$0xff] }
 0xe00   :  { %v1241_v20 = vmul.f32 %v1239_v4, %v1795_v31  ;;  %1435 = vmatpush.msra.mxu2 %v1410_v3 }
 0xe02   :  { %v1243_v6 = vsub.f32 %v2240_v0, %v1241_v20 }
 0xe04   :  { %v1245_v8 = vmul.f32 %v1243_v6, %v1243_v6 }
 0xe06   :  { %v1249_v49 = vsel %vm72_vm1, %v1245_v8, 0.0  ;;  %v1409_v8 = vld [vmem:[%s2364_s1 + $0x118] sm:$0xff] }
 0xe07   :  { %1250 = vadd.xlane.f32.xlu2 %v1249_v49  ;;  %1436 = vmatpush.msra.mxu2 %v1409_v8 }
 0xe09   :  { %1437 = vmatpush.msra.mxu2 %v1408_v58 }
 0xe72   :  { %v1248_v11 = vpop.xlane.xlu1 %1247 }
 0xe73   :  { %v1252_v12 = vmul.f32 %v1248_v11, %v1795_v31 }
 0xe75   :  { %v1254_v13 = vadd.f32 1e-05, %v1252_v12 }
 0xe77   :  { %1709 = vrsqrt.f32 %v1254_v13  ;;  %vm1262_vm14 = vweird.f32 %v1254_v13 }
 0xe7a   :  { %v1251_v14 = vpop.xlane.xlu2 %1250 }
 0xe7b   :  { %v1253_v48 = vmul.f32 %v1251_v14, %v1795_v31  ;;  %v1407_v14 = vld [vmem:[%s2364_s1 + $0x108] sm:$0xff] }
 0xe7c   :  { %1438 = vmatpush.msra.mxu2 %v1407_v14 }
 0xe7d   :  { %v1710_v15 = vpop.eup %1709  ;;  %v1255_v16 = vadd.f32 1e-05, %v1253_v48 }
 0xe7e   :  { %v1257_v17 = vmul.f32 %v1710_v15, %v1254_v13  ;;  %vm1263_vm13 = vweird.f32 %v1710_v15 }
 0xe7f   :  { %1711 = vrsqrt.f32 %v1255_v16  ;;  %vm1264_vm15 = vmor %vm1262_vm14, %vm1263_vm13  ;;  %vm1272_vm2 = vweird.f32 %v1255_v16  ;;  %vm1471_vm13 = vcmask 1040384   ;;  %vm1475_vm14 = vcmask 254976  }
 0xe80   :  { %v1258_v18 = vmul.f32 %v1710_v15, %v1257_v17 }
 0xe82   :  { %v1259_v34 = vmul.f32 0.5, %v1258_v18 }
 0xe84   :  { %v1260_v21 = vsub.f32 1.5, %v1259_v34 }
 0xe85   :  { %v1712_v22 = vpop.eup %1711 }
 0xe86   :  { %v1261_v23 = vmul.f32 %v1710_v15, %v1260_v21  ;;  %v1267_v24 = vmul.f32 %v1712_v22, %v1255_v16  ;;  %vm1273_vm0 = vweird.f32 %v1712_v22 }
 0xe87   :  { %vm1274_vm3 = vmor %vm1272_vm2, %vm1273_vm0 }
 0xe88   :  { %v1265_v26 = vsel %vm1264_vm15, %v1710_v15, %v1261_v23  ;;  %v1268_v50 = vmul.f32 %v1712_v22, %v1267_v24 }
 0xe89   :  { %v1276_v27 = vmul.f32 %v1265_v26, %v1242_v46 }
 0xe8a   :  { %v1269_v28 = vmul.f32 0.5, %v1268_v50 }
 0xe8b   :  { %v1279_v29 = vmul.f32 %v1656_v25, %v1276_v27 }
 0xe8c   :  { %v1270_v30 = vsub.f32 1.5, %v1269_v28 }
 0xe8d   :  { %v1282_v35 = vadd.f32 %v1657_v42, %v1279_v29 }
 0xe8e   :  { %v1271_v39 = vmul.f32 %v1712_v22, %v1270_v30 }
 0xe8f   :  { %1630 = vmatmul.msk.f32.vlgmr.msra.gmra.mxu0 %vm72_vm1, %v1282_v35 }
 0xe90   :  { %v1275_v43 = vsel %vm1274_vm3, %v1712_v22, %v1271_v39 }
 0xe91   :  { %v1277_v51 = vmul.f32 %v1275_v43, %v1243_v6 }
 0xe93   :  { %v1280_v5 = vmul.f32 %v1656_v25, %v1277_v51 }
 0xe95   :  { %v1283_v19 = vadd.f32 %v1657_v42, %v1280_v5 }
 0xe97   :  { %1631 = vmatmul.msk.f32.gmra.mxu0 %vm72_vm1, %v1283_v19 }
 0xf0c   :  { %v1313_v7 = vpop.f32.mrf.mxu0 }
 0xf0d   :  { %v2275_v40 = vadd.f32 %v1658_v38, %v1313_v7 }
 0xf0f   :  { %v2278_v47 = vmul.f32 0.70710677, %v2275_v40 }
 0xf11   :  { %v1323_v52 = vmul.f32 %v2278_v47, %v2278_v47 }
 0xf13   :  { %v1324_v33 = vmin.f32 %v1323_v52, 16.0 }
 0xf14   :  { %v1316_v54 = vpop.f32.mrf.mxu0 }
 0xf15   :  { %v1325_v56 = vmul.f32 2.1237322e-06, %v1324_v33  ;;  %v1336_v57 = vmul.f32 3.8918573e-05, %v1324_v33  ;;  %v2285_v53 = vadd.f32 %v1658_v38, %v1316_v54 }
 0xf17   :  { %v1326_v32 = vadd.f32 0.00028619796, %v1325_v56  ;;  %v1337_v44 = vadd.f32 0.001143296, %v1336_v57  ;;  %v2291_v61 = vmul.f32 0.70710677, %v2285_v53 }
 0xf19   :  { %v1327_v63 = vmul.f32 %v1326_v32, %v1324_v33  ;;  %v1338_v59 = vmul.f32 %v1337_v44, %v1324_v33  ;;  %v1363_v37 = vmul.f32 %v2291_v61, %v2291_v61 }
 0xf1b   :  { %v1339_v1 = vadd.f32 0.014752088, %v1338_v59  ;;  %v1328_v46 = vadd.f32 0.0036580483, %v1327_v63  ;;  %v1364_v2 = vmin.f32 %v1363_v37, 16.0 }
 0xf1d   :  { %v1340_v4 = vmul.f32 %v1339_v1, %v1324_v33  ;;  %v1365_v20 = vmul.f32 2.1237322e-06, %v1364_v2  ;;  %v1376_v6 = vmul.f32 3.8918573e-05, %v1364_v2  ;;  %v1329_v9 = vmul.f32 %v1328_v46, %v1324_v33 }
 0xf1e   :  { %v1319_v46 = vmul.f32 0.5, %v2275_v40  ;;  %v1659_v40 = vld [vmem:[%s2364_s1 + $0x17b] ss:$0 sm:$0xff] }
 0xf1f   :  { %v1341_v49 = vadd.f32 0.112945676, %v1340_v4  ;;  %v1366_v10 = vadd.f32 0.00028619796, %v1365_v20  ;;  %v1377_v41 = vadd.f32 0.001143296, %v1376_v6 }
 0xf20   :  { %v1330_v15 = vadd.f32 0.05243302, %v1329_v9 }
 0xf21   :  { %v1342_v11 = vmul.f32 %v1341_v49, %v1324_v33  ;;  %v1367_v12 = vmul.f32 %v1366_v10, %v1364_v2  ;;  %v1378_v13 = vmul.f32 %v1377_v41, %v1364_v2  ;;  %v1320_v10 = vmul.f32 0.5, %v2285_v53 }
 0xf22   :  { %v1331_v22 = vmul.f32 %v1330_v15, %v1324_v33 }
 0xf23   :  { %v1343_v48 = vadd.f32 0.4994258, %v1342_v11  ;;  %v1379_v16 = vadd.f32 0.014752088, %v1378_v13  ;;  %v1368_v18 = vadd.f32 0.0036580483, %v1367_v12 }
 0xf24   :  { %v1332_v26 = vadd.f32 0.18741608, %v1331_v22  ;;  %v1724_v11 = vmov 8.0  }
 0xf25   :  { %v1344_v17 = vmul.f32 %v1343_v48, %v1324_v33  ;;  %v1380_v34 = vmul.f32 %v1379_v16, %v1364_v2  ;;  %v1369_v24 = vmul.f32 %v1368_v18, %v1364_v2 }
 0xf26   :  { %v1333_v29 = vmul.f32 %v1332_v26, %v1324_v33 }
 0xf27   :  { %v1345_v21 = vadd.f32 1.0, %v1344_v17  ;;  %v1381_v23 = vadd.f32 0.112945676, %v1380_v34  ;;  %v1370_v27 = vadd.f32 0.05243302, %v1369_v24 }
 0xf28   :  { %v1334_v5 = vadd.f32 1.1283791, %v1333_v29 }
 0xf29   :  { %1713 = vrcp.f32 %v1345_v21  ;;  %v1382_v25 = vmul.f32 %v1381_v23, %v1364_v2  ;;  %v1371_v39 = vmul.f32 %v1370_v27, %v1364_v2  ;;  %v1357_v51 = vand.u32 2147483648, %v1345_v21 }
 0xf2a   :  { %v1355_v38 = vand.u32 2147483647, %v1345_v21  ;;  %vm1351_vm5 = vweird.f32 %v1345_v21  ;;  %v1335_v56 = vmul.f32 %v1334_v5, %v2278_v47 }
 0xf2b   :  { %v1383_v50 = vadd.f32 0.4994258, %v1382_v25  ;;  %v1372_v7 = vadd.f32 0.18741608, %v1371_v39  ;;  %v1358_v54 = vor.u32 1.1754944e-38, %v1357_v51 }
 0xf2c   :  { %vm1356_vm7 = vcmp.eq.f32.partialorder %v1355_v38, 8.507059e+37 }
 0xf2d   :  { %v1384_v42 = vmul.f32 %v1383_v50, %v1364_v2  ;;  %v1373_v60 = vmul.f32 %v1372_v7, %v1364_v2 }
 0xf2f   :  { %v1714_v28 = vpop.eup %1713  ;;  %v1385_v35 = vadd.f32 1.0, %v1384_v42  ;;  %v1374_v37 = vadd.f32 1.1283791, %v1373_v60 }
 0xf30   :  { %v1347_v30 = vmul.f32 %v1714_v28, %v1345_v21  ;;  %vm1352_vm4 = vweird.f32 %v1714_v28 }
 0xf31   :  { %1715 = vrcp.f32 %v1385_v35  ;;  %vm1353_vm6 = vmor %vm1351_vm5, %vm1352_vm4  ;;  %v1397_v59 = vand.u32 2147483648, %v1385_v35  ;;  %v1395_v1 = vand.u32 2147483647, %v1385_v35  ;;  %vm1391_vm9 = vweird.f32 %v1385_v35 }
 0xf32   :  { %v1348_v43 = vsub.f32 1.0, %v1347_v30  ;;  %v1375_v6 = vmul.f32 %v1374_v37, %v2291_v61  ;;  %1717 = vrcp.f32 %v1724_v11 }
 0xf33   :  { %v1398_v47 = vor.u32 1.1754944e-38, %v1397_v59  ;;  %vm1396_vm12 = vcmp.eq.f32.partialorder %v1395_v1, 8.507059e+37  ;;  %v1660_v1 = vld [vmem:[%s2364_s1 + $0x16f] ss:$0 sm:$0xff] }
 0xf34   :  { %v1349_v19 = vmul.f32 %v1714_v28, %v1348_v43 }
 0xf36   :  { %v1350_v52 = vadd.f32 %v1714_v28, %v1349_v19 }
 0xf37   :  { %v1716_v55 = vpop.eup %1715 }
 0xf38   :  { %v1354_v57 = vsel %vm1353_vm6, %v1714_v28, %v1350_v52  ;;  %v1387_v32 = vmul.f32 %v1716_v55, %v1385_v35  ;;  %vm1392_vm8 = vweird.f32 %v1716_v55  ;;  %v1718_v14 = vpop.eup %1717 }
 0xf39   :  { %v1359_v33 = vsel %vm1356_vm7, %v1358_v54, %v1354_v57  ;;  %vm1393_vm11 = vmor %vm1391_vm9, %vm1392_vm8  ;;  %v1456_v16 = vmul.f32 8.0, %v1718_v14  ;;  %v1549_v57 = vld [vmem:[%s2364_s1 + $0x160] sm:$0xff] }
 0xf3a   :  { %v1360_v44 = vmul.f32 %v1359_v33, %v1335_v56  ;;  %v1388_v62 = vsub.f32 1.0, %v1387_v32  ;;  %v1548_v33 = vld [vmem:[%s2364_s1 + $0x158] sm:$0xff]  ;;  %1567 = vmatpush.msra.mxu3 %v1549_v57  ;;  %v1547_v32 = vld [vmem:[%s2364_s1 + $0x150] sm:$0xff] }
 0xf3b   :  { %v1457_v22 = vsub.f32 1.0, %v1456_v16 }
 0xf3c   :  { %v1632_v63 = vclamps-f32 %v1360_v44, 1.0  ;;  %v1389_v45 = vmul.f32 %v1716_v55, %v1388_v62  ;;  %1568 = vmatpush.msra.mxu3 %v1548_v33 }
 0xf3d   :  { %v1458_v25 = vmul.f32 %v1718_v14, %v1457_v22 }
 0xf3e   :  { %v1403_v3 = vadd.f32 1.0, %v1632_v63  ;;  %v1390_v4 = vadd.f32 %v1716_v55, %v1389_v45  ;;  %1569 = vmatpush.msra.mxu3 %v1547_v32 }
 0xf3f   :  { %v1459_v42 = vadd.f32 %v1718_v14, %v1458_v25 }
 0xf40   :  { %v1405_v20 = vmul.f32 %v1403_v3, %v1319_v46  ;;  %v1394_v2 = vsel %vm1393_vm11, %v1716_v55, %v1390_v4  ;;  %v1661_v3 = vld [vmem:[%s2364_s1 + $0x170] ss:$0 sm:$0xff] }
 0xf41   :  { %v1399_v8 = vsel %vm1396_vm12, %v1398_v47, %v1394_v2 }
 0xf42   :  { %1634 = vmatmul.msk.f32.vlgmr.msra.gmra.mxu2 %vm714_vm10, %v1405_v20  ;;  %v1400_v49 = vmul.f32 %v1399_v8, %v1375_v6 }
 0xf44   :  { %v1633_v9 = vclamps-f32 %v1400_v49, 1.0 }
 0xf46   :  { %v1404_v41 = vadd.f32 1.0, %v1633_v9 }
 0xf48   :  { %v1406_v58 = vmul.f32 %v1404_v41, %v1320_v10 }
 0xf4a   :  { %1635 = vmatmul.msk.f32.gmra.mxu2 %vm714_vm10, %v1406_v58  ;;  %vm1460_vm10 = vweird.f32 %v1718_v14 }
 0xfc5   :  { %v1440_v61 = vpop.f32.mrf.mxu2 }
 0xfc6   :  { %v1441_v12 = vadd.f32 %v1659_v40, %v1440_v61 }
 0xfc8   :  { %v1446_v13 = vadd.f32 %v1441_v12, %v2235_v36 }
 0xfca   :  { %v1448_v48 = vsel %vm72_vm1, %v1446_v13, 0.0  ;;  %1575 = vst.msk [vmem:[%s2368_s4] sm:$0xff] %vm72_vm1, %v1446_v13 }
 0xfcb   :  { %v1449_v53 = vrot.slane %v1448_v48, 4 }
 0xfcd   :  { %v1450_v15 = vadd.f32 %v1449_v53, %v1448_v48  ;;  %v1443_v17 = vpop.f32.mrf.mxu2 }
 0xfce   :  { %v1444_v18 = vadd.f32 %v1659_v40, %v1443_v17 }
 0xfcf   :  { %v1451_v34 = vrot.slane %v1450_v15, 2 }
 0xfd0   :  { %v1447_v21 = vadd.f32 %v1444_v18, %v2240_v0  ;;  %v1461_v0 = vsel %vm1460_vm10, %v1718_v14, %v1459_v42 }
 0xfd1   :  { %v1452_v36 = vadd.f32 %v1451_v34, %v1450_v15 }
 0xfd2   :  { %v1463_v23 = vsel %vm72_vm1, %v1447_v21, 0.0  ;;  %1576 = vst.msk [vmem:[%s2368_s4 + $0x8] sm:$0xff] %vm72_vm1, %v1447_v21 }
 0xfd3   :  { %v1464_v24 = vrot.slane %v1463_v23, 4  ;;  %v1453_v50 = vrot.slane %v1452_v36, 1 }
 0xfd5   :  { %v1465_v26 = vadd.f32 %v1464_v24, %v1463_v23  ;;  %v1454_v30 = vadd.f32 %v1453_v50, %v1452_v36 }
 0xfd7   :  { %v1466_v27 = vrot.slane %v1465_v26, 2  ;;  %v1462_v39 = vmul.f32 %v1461_v0, %v1454_v30 }
 0xfd9   :  { %v1467_v28 = vadd.f32 %v1466_v27, %v1465_v26 }
 0xfdb   :  { %v1468_v29 = vrot.slane %v1467_v28, 1 }
 0xfdd   :  { %v1469_v35 = vadd.f32 %v1468_v29, %v1467_v28 }
 0xfdf   :  { %v1470_v43 = vmul.f32 %v1469_v35, %v1461_v0 }
 0xfe1   :  { %v1472_v51 = vsel %vm1471_vm13, %v1462_v39, %v1470_v43 }
 0xfe2   :  { %v1476_v5 = vsel %vm1475_vm14, %v1472_v51, 0.0 }
 0xfe3   :  { %1477 = vadd.xlane.f32.xlu0 %v1476_v5  ;;  %v1662_v5 = vld [vmem:[%s2364_s1 + $0x171] ss:$0 sm:$0xff] }
0x1056   :  { %v1478_v19 = vpop.xlane.xlu0 %1477 }
0x1057   :  { %v1479_v38 = vmul.f32 %v1478_v19, %v1795_v31 }
0x1059   :  { %v1480_v7 = vsub.f32 %v1472_v51, %v1479_v38 }
0x105b   :  { %v1481_v52 = vmul.f32 %v1480_v7, %v1480_v7 }
0x105d   :  { %v1482_v54 = vsel %vm1475_vm14, %v1481_v52, 0.0 }
0x105e   :  { %1483 = vadd.xlane.f32.xlu1 %v1482_v54 }
0x10d1   :  { %v1484_v55 = vpop.xlane.xlu1 %1483 }
0x10d2   :  { %v1485_v56 = vmul.f32 %v1484_v55, %v1795_v31  ;;  %v1546_v31 = vld [vmem:[%s2364_s1 + $0x148] sm:$0xff] }
0x10d3   :  { %1570 = vmatpush.msra.mxu3 %v1546_v31 }
0x10d4   :  { %v1486_v60 = vadd.f32 1e-05, %v1485_v56 }
0x10d6   :  { %1719 = vrsqrt.f32 %v1486_v60  ;;  %vm1493_vm0 = vweird.f32 %v1486_v60 }
0x10dc   :  { %v1720_v44 = vpop.eup %1719 }
0x10dd   :  { %v1488_v62 = vmul.f32 %v1720_v44, %v1486_v60  ;;  %vm1494_vm15 = vweird.f32 %v1720_v44 }
0x10de   :  { %vm1495_vm2 = vmor %vm1493_vm0, %vm1494_vm15 }
0x10df   :  { %v1489_v63 = vmul.f32 %v1720_v44, %v1488_v62 }
0x10e1   :  { %v1490_v59 = vmul.f32 0.5, %v1489_v63 }
0x10e3   :  { %v1491_v37 = vsub.f32 1.5, %v1490_v59 }
0x10e5   :  { %v1492_v45 = vmul.f32 %v1720_v44, %v1491_v37 }
0x10e7   :  { %v1496_v46 = vsel %vm1495_vm2, %v1720_v44, %v1492_v45 }
0x10e8   :  { %v1497_v4 = vmul.f32 %v1496_v46, %v1480_v7 }
0x10ea   :  { %v1499_v20 = vmul.f32 %v1660_v1, %v1497_v4 }
0x10ec   :  { %v1501_v47 = vadd.f32 %v1661_v3, %v1499_v20 }
0x10ee   :  { %v1503_v6 = vmul.f32 0.70710677, %v1501_v47  ;;  %v1502_v39 = vmul.f32 0.5, %v1501_v47 }
0x10f0   :  { %v1504_v2 = vmul.f32 %v1503_v6, %v1503_v6 }
0x10f2   :  { %v1505_v8 = vmin.f32 %v1504_v2, 16.0 }
0x10f4   :  { %v1506_v49 = vmul.f32 2.1237322e-06, %v1505_v8  ;;  %v1517_v9 = vmul.f32 3.8918573e-05, %v1505_v8 }
0x10f6   :  { %v1507_v10 = vadd.f32 0.00028619796, %v1506_v49  ;;  %v1518_v41 = vadd.f32 0.001143296, %v1517_v9 }
0x10f8   :  { %v1508_v58 = vmul.f32 %v1507_v10, %v1505_v8  ;;  %v1519_v40 = vmul.f32 %v1518_v41, %v1505_v8 }
0x10fa   :  { %v1520_v11 = vadd.f32 0.014752088, %v1519_v40  ;;  %v1509_v61 = vadd.f32 0.0036580483, %v1508_v58 }
0x10fc   :  { %v1521_v12 = vmul.f32 %v1520_v11, %v1505_v8  ;;  %v1510_v14 = vmul.f32 %v1509_v61, %v1505_v8 }
0x10fe   :  { %v1522_v13 = vadd.f32 0.112945676, %v1521_v12  ;;  %v1511_v15 = vadd.f32 0.05243302, %v1510_v14 }
0x1100   :  { %v1523_v48 = vmul.f32 %v1522_v13, %v1505_v8  ;;  %v1512_v18 = vmul.f32 %v1511_v15, %v1505_v8 }
0x1102   :  { %v1524_v53 = vadd.f32 0.4994258, %v1523_v48  ;;  %v1513_v34 = vadd.f32 0.18741608, %v1512_v18 }
0x1104   :  { %v1525_v16 = vmul.f32 %v1524_v53, %v1505_v8  ;;  %v1514_v22 = vmul.f32 %v1513_v34, %v1505_v8 }
0x1106   :  { %v1526_v17 = vadd.f32 1.0, %v1525_v16  ;;  %v1515_v25 = vadd.f32 1.1283791, %v1514_v22 }
0x1108   :  { %1721 = vrcp.f32 %v1526_v17  ;;  %v1538_v24 = vand.u32 2147483648, %v1526_v17  ;;  %v1536_v50 = vand.u32 2147483647, %v1526_v17  ;;  %vm1532_vm4 = vweird.f32 %v1526_v17 }
0x1109   :  { %v1516_v28 = vmul.f32 %v1515_v25, %v1503_v6 }
0x110a   :  { %v1539_v42 = vor.u32 1.1754944e-38, %v1538_v24  ;;  %vm1537_vm6 = vcmp.eq.f32.partialorder %v1536_v50, 8.507059e+37 }
0x110e   :  { %v1722_v21 = vpop.eup %1721 }
0x110f   :  { %v1528_v23 = vmul.f32 %v1722_v21, %v1526_v17  ;;  %vm1533_vm3 = vweird.f32 %v1722_v21 }
0x1110   :  { %vm1534_vm5 = vmor %vm1532_vm4, %vm1533_vm3 }
0x1111   :  { %v1529_v36 = vsub.f32 1.0, %v1528_v23 }
0x1113   :  { %v1530_v26 = vmul.f32 %v1722_v21, %v1529_v36 }
0x1115   :  { %v1531_v27 = vadd.f32 %v1722_v21, %v1530_v26 }
0x1117   :  { %v1535_v29 = vsel %vm1534_vm5, %v1722_v21, %v1531_v27 }
0x1118   :  { %v1540_v30 = vsel %vm1537_vm6, %v1539_v42, %v1535_v29 }
0x1119   :  { %v1541_v0 = vmul.f32 %v1540_v30, %v1516_v28 }
0x111b   :  { %v1636_v35 = vclamps-f32 %v1541_v0, 1.0 }
0x111d   :  { %v1544_v43 = vadd.f32 1.0, %v1636_v35 }
0x111f   :  { %v1545_v51 = vmul.f32 %v1544_v43, %v1502_v39 }
0x1121   :  { %1637 = vmatmul.msk.f32.vlgmr.msra.gmra.mxu3 %vm72_vm1, %v1545_v51 }
0x11a4   :  { %v1572_v19 = vpop.f32.mrf.mxu3 }
0x11a5   :  { %v1573_v38 = vadd.f32 %v1662_v5, %v1572_v19 }
0x11a7   :  { %1577 = vst.msk [vmem:[%s2368_s4 + $0x10] sm:$0x3] %vm1475_vm14, %v1573_v38 }

</bundles_post_ra>
